<compile_context>
chip_gen: v7x
topology: tpu7x:2x2x1
jax: 0.10.0
libtpu: 0.0.40
codegen_flags: <defaults>
</compile_context>

<pallas_src>
import functools

import jax
import jax.numpy as jnp
import numpy as np
from jax.experimental import pallas as pl
from jax.experimental.pallas import tpu as pltpu


def _round_up(n, m):
    return ((n + m - 1) // m) * m


def _cdiv(a, b):
    return (a + b - 1) // b


def _pad2(w, rows, cols):
    return jnp.pad(w, ((0, rows - w.shape[0]), (0, cols - w.shape[1])))


# -----------------------------------------------------------------------------
# Kernel
# -----------------------------------------------------------------------------
def vade_fwd_kernel(
    x_ref,                       # [bb, input_dim] batch tile (f32 or bf16)
    we1_ref, be1_ref,            # encoder layer 1: input_dim -> e1p
    we2_ref, be2_ref,            # encoder layer 2: e1p -> e2p
    wh_ref, bh_ref,              # fused heads:     e2p -> hpad (mu|logvar|0)
    wfs_ref, bfs_ref,            # dec_first_stage: hpad -> d0p (rows>=z_dim are 0)
    wd1_ref, bd1_ref,            # decoder hidden:  d0p -> d1p
    wdo_ref, bdo_ref,            # decoder out:     d1p -> input_dim (sigmoid)
    recon_ref,                   # [bb, input_dim]
    head_ref,                    # [bb, 2*z_dim]   (mu | logvar)
    *, act_dtype, two_z,
):
    def linear(a, w_ref, b_ref):
        w = w_ref[...]
        # cast activation to weight dtype (no-op for f32); f32 accumulation,
        # f32 bias + epilogue.
        return jnp.dot(a.astype(w.dtype), w,
                       preferred_element_type=jnp.float32) + b_ref[...]

    def relu(v):
        # materialize intermediates in act_dtype (bf16 on the fast path) so
        # any vreg spill / VMEM round-trip is half-width; the next matmul
        # wants that dtype anyway.
        return jnp.maximum(v, 0.0).astype(act_dtype)

    x = x_ref[...]

    # ----- encoder (Linear + ReLU stack), lane-dense padded widths -----
    h = relu(linear(x, we1_ref, be1_ref))
    h = relu(linear(h, we2_ref, be2_ref))

    # ----- fused latent heads: one matmul -> (mu | logvar | 0) slab -----
    head = linear(h, wh_ref, bh_ref)                  # [bb, hpad] f32
    # write back only the real 2*z_dim lanes (no padded-lane HBM writeback).
    head_ref[...] = head[:, :two_z].astype(head_ref.dtype)

    # eval-mode reparametrize: z = mu.  dec_first_stage's weight is zero-padded
    # on its input rows, so feeding the full slab is exactly dot(mu, wfs).
    d = relu(linear(head, wfs_ref, bfs_ref))
    d = relu(linear(d, wd1_ref, bd1_ref))

    recon_ref[...] = jax.nn.sigmoid(
        linear(d, wdo_ref, bdo_ref)).astype(recon_ref.dtype)


# -----------------------------------------------------------------------------
# Wrapper
# -----------------------------------------------------------------------------
def vade_forward(x, params, *, block_b=512,
                 weight_dtype=jnp.bfloat16,       # fast path default
                 head_weight_dtype=jnp.float32,   # keep latents accurate
                 recon_dtype=jnp.float32,
                 head_dtype=jnp.float32):
    """x: [B, input_dim] float32. params: flat list of 14 (W_t[in,out], b[1,out])."""
    (we1, be1, we2, be2, wmu, bmu, wlv, blv,
     wfs, bfs, wd1, bd1, wdo, bdo) = params

    B, input_dim = x.shape
    e1, e2 = we1.shape[1], we2.shape[1]
    z_dim = wmu.shape[1]
    d0, d1 = wfs.shape[1], wd1.shape[1]
    two_z = 2 * z_dim

    # --- lane-dense padding of every hidden width to a multiple of 128 -------
    e1p = _round_up(e1, 128)
    e2p = _round_up(e2, 128)
    hpad = _round_up(two_z, 128)
    d0p = _round_up(d0, 128)
    d1p = _round_up(d1, 128)

    we1_p = _pad2(we1, input_dim, e1p)
    be1_p = _pad2(be1, 1, e1p)
    we2_p = _pad2(we2, e1p, e2p)
    be2_p = _pad2(be2, 1, e2p)
    # fused mu/logvar head: (mu | logvar | 0) slab
    w_head = _pad2(jnp.concatenate([wmu, wlv], axis=1), e2p, hpad)
    b_head = _pad2(jnp.concatenate([bmu, blv], axis=1), 1, hpad)
    # dec_first_stage: zero rows for logvar/pad lanes so slab @ wfs == mu @ wfs
    wfs_p = _pad2(wfs, hpad, d0p)
    bfs_p = _pad2(bfs, 1, d0p)
    wd1_p = _pad2(wd1, d0p, d1p)
    bd1_p = _pad2(bd1, 1, d1p)
    wdo_p = _pad2(wdo, d1p, input_dim)

    # --- dtypes: bf16 weights/x/activations, f32 accumulation & biases -------
    wdt = jnp.dtype(weight_dtype)
    hdt = jnp.dtype(head_weight_dtype)
    act_dtype = wdt if wdt.itemsize < 4 else jnp.dtype(jnp.float32)
    we1_c, we2_c = we1_p.astype(wdt), we2_p.astype(wdt)
    wh_c = w_head.astype(hdt)
    wfs_c, wd1_c, wdo_c = wfs_p.astype(wdt), wd1_p.astype(wdt), wdo_p.astype(wdt)
    x_in = x.astype(wdt) if wdt.itemsize < 4 else x

    # --- batch tiling: pick tile count first, then minimal padded tile -------
    sub = 16 if min(jnp.dtype(x_in.dtype).itemsize,
                    jnp.dtype(recon_dtype).itemsize,
                    jnp.dtype(head_dtype).itemsize) < 4 else 8
    ntiles = max(1, _cdiv(B, block_b))
    if ntiles > 1:
        ntiles = _round_up(ntiles, 2)     # even grid keeps both v7x TCs busy
    bb = _round_up(_cdiv(B, ntiles), sub)
    b_pad = bb * ntiles
    x_p = jnp.pad(x_in, ((0, b_pad - B), (0, 0))) if b_pad != B else x_in
    grid = (ntiles,)

    def batch_map(i):
        return (i, 0)

    def const_map(i):
        return (0, 0)

    kernel_args = (x_p,
                   we1_c, be1_p, we2_c, be2_p,
                   wh_c, b_head,
                   wfs_c, bfs_p, wd1_c, bd1_p, wdo_c, bdo)

    out_shapes = (
        jax.ShapeDtypeStruct((b_pad, input_dim), jnp.dtype(recon_dtype)),
        jax.ShapeDtypeStruct((b_pad, two_z), jnp.dtype(head_dtype)),
    )
    out_specs = (
        pl.BlockSpec((bb, input_dim), batch_map),
        pl.BlockSpec((bb, two_z), batch_map),
    )

    # --- VMEM budget / cost estimate -----------------------------------------
    weight_bytes = sum(int(a.size) * np.dtype(a.dtype).itemsize
                       for a in kernel_args[1:])
    act_bytes = bb * (e1p + e2p + hpad + d0p + d1p + input_dim) * 4
    io_bytes = 2 * bb * (input_dim * np.dtype(x_p.dtype).itemsize
                         + input_dim * np.dtype(recon_dtype).itemsize
                         + two_z * np.dtype(head_dtype).itemsize)
    est = 2 * (weight_bytes + act_bytes + io_bytes) + (8 << 20)
    vmem_limit = int(min(max(est, 24 << 20), 48 << 20))   # safe on v5e/v6e/v7x

    flops = 2 * b_pad * (input_dim * e1p + e1p * e2p + e2p * hpad
                         + hpad * d0p + d0p * d1p + d1p * input_dim)
    bytes_accessed = (weight_bytes
                      + b_pad * input_dim * np.dtype(x_p.dtype).itemsize
                      + b_pad * input_dim * np.dtype(recon_dtype).itemsize
                      + b_pad * two_z * np.dtype(head_dtype).itemsize)
    cost = pl.CostEstimate(flops=int(flops),
                           transcendentals=int(b_pad * input_dim),
                           bytes_accessed=int(bytes_accessed))

    kernel_fn = functools.partial(vade_fwd_kernel,
                                  act_dtype=act_dtype, two_z=two_z)

    def build_call(buffered_weights):
        in_specs = [pl.BlockSpec((bb, input_dim), batch_map)]
        for a in kernel_args[1:]:
            if buffered_weights:
                # constant index -> second pipeline buffer is dead VMEM
                in_specs.append(pl.BlockSpec(a.shape, const_map,
                                             pipeline_mode=pl.Buffered(1)))
            else:
                in_specs.append(pl.BlockSpec(a.shape, const_map))
        return pl.pallas_call(
            kernel_fn,
            out_shape=out_shapes,
            grid=grid,
            in_specs=in_specs,
            out_specs=out_specs,
            compiler_params=pltpu.CompilerParams(
                dimension_semantics=("parallel",),
                vmem_limit_bytes=vmem_limit),
            cost_estimate=cost,
        )

    try:
        recon_p, head_p = build_call(True)(*kernel_args)
    except Exception:
        # fall back to default double-buffered weight specs if single
        # buffering is rejected by this jax/Mosaic version.
        recon_p, head_p = build_call(False)(*kernel_args)

    recon = recon_p[:B]
    mu = head_p[:B, :z_dim]
    logvar = head_p[:B, z_dim:two_z]
    z = mu   # eval-mode reparametrize: z == mu, no separate HBM writeback
    return z, recon, mu, logvar


# -----------------------------------------------------------------------------
# Parameter construction + pure-JAX reference
# -----------------------------------------------------------------------------
def _init_linear(key, fan_in, fan_out):
    """Mimics PyTorch nn.Linear default init; W stored transposed [in, out]."""
    kw, kb = jax.random.split(key)
    bound = 1.0 / np.sqrt(fan_in)
    w_t = jax.random.uniform(kw, (fan_in, fan_out), jnp.float32, -bound, bound)
    b = jax.random.uniform(kb, (1, fan_out), jnp.float32, -bound, bound)
    return w_t, b


def build_vade_params(key, input_dim, encoder_dims, z_dim, decoder_dims):
    """Matches VaDE.__init__ Linear shapes (weights stored transposed)."""
    keys = jax.random.split(key, 8)
    params = []
    enc_layers = [input_dim] + encoder_dims
    for i in range(1, len(enc_layers)):
        w, b = _init_linear(keys[i - 1], enc_layers[i - 1], enc_layers[i])
        params += [w, b]
    wmu, bmu = _init_linear(keys[2], encoder_dims[-1], z_dim)
    wlv, blv = _init_linear(keys[3], encoder_dims[-1], z_dim)
    params += [wmu, bmu, wlv, blv]
    wfs, bfs = _init_linear(keys[4], z_dim, decoder_dims[0])
    params += [wfs, bfs]
    wd1, bd1 = _init_linear(keys[5], decoder_dims[0], decoder_dims[1])
    params += [wd1, bd1]
    wdo, bdo = _init_linear(keys[6], decoder_dims[-1], input_dim)
    params += [wdo, bdo]
    return params


def vade_forward_ref(x, params):
    (we1, be1, we2, be2, wmu, bmu, wlv, blv,
     wfs, bfs, wd1, bd1, wdo, bdo) = params
    hp = jax.lax.Precision.HIGHEST
    dot = lambda a, b: jnp.dot(a, b, precision=hp)
    h = jnp.maximum(dot(x, we1) + be1, 0.0)
    h = jnp.maximum(dot(h, we2) + be2, 0.0)
    mu = dot(h, wmu) + bmu
    logvar = dot(h, wlv) + blv
    z = mu
    d = jnp.maximum(dot(z, wfs) + bfs, 0.0)
    d = jnp.maximum(dot(d, wd1) + bd1, 0.0)
    recon = jax.nn.sigmoid(dot(d, wdo) + bdo)
    return z, recon, mu, logvar


# -----------------------------------------------------------------------------
# Demo / correctness check
# -----------------------------------------------------------------------------
if __name__ == "__main__":
    input_dim = 256
    encoder_dims = [128, 64]
    z_dim = 32
    decoder_dims = [64, 128]
    # n_centroids = 10  # theta_p / u_p / lambda_p are not used in forward()

    key = jax.random.PRNGKey(0)
    kx, kx2, kp = jax.random.split(key, 3)
    params = build_vade_params(kp, input_dim, encoder_dims, z_dim, decoder_dims)

    # ---- f32 path, single tile ------------------------------------------------
    B = 8
    x = jax.random.uniform(kx, (B, input_dim), jnp.float32)
    out = jax.block_until_ready(vade_forward(x, params, weight_dtype=jnp.float32))
    ref = vade_forward_ref(x, params)
    for o, r in zip(out, ref):
        np.testing.assert_allclose(np.asarray(o, dtype=np.float32),
                                   np.asarray(r), rtol=1e-4, atol=1e-4)

    # ---- f32 path, multi-tile grid + even-grid rounding + batch padding -------
    B2 = 300
    x2 = jax.random.uniform(kx2, (B2, input_dim), jnp.float32)
    out2 = jax.block_until_ready(
        vade_forward(x2, params, block_b=128, weight_dtype=jnp.float32))
    ref2 = vade_forward_ref(x2, params)
    for o, r in zip(out2, ref2):
        np.testing.assert_allclose(np.asarray(o, dtype=np.float32),
                                   np.asarray(r), rtol=1e-4, atol=1e-4)

    # ---- default fast path: bf16 weights + bf16 x + bf16 intermediates --------
    out_fast = jax.block_until_ready(vade_forward(x2, params))
    for o, r in zip(out_fast, ref2):
        np.testing.assert_allclose(np.asarray(o, dtype=np.float32),
                                   np.asarray(r), rtol=1e-1, atol=5e-2)

    # ---- bf16 recon output flag ------------------------------------------------
    out_b16 = jax.block_until_ready(
        vade_forward(x, params, recon_dtype=jnp.bfloat16))
    np.testing.assert_allclose(np.asarray(out_b16[1], dtype=np.float32),
                               np.asarray(ref[1]), rtol=1e-1, atol=5e-2)

    print("KERNEL_OK")
</pallas_src>

<mosaic_0001>
module attributes {stable_mosaic.version = 11 : i64} {
  func.func @vade_fwd_kernel(%arg0: i32, %arg1: memref<8x256xf32, #tpu.memory_space<vmem>>, %arg2: memref<256x128xf32, #tpu.memory_space<vmem>>, %arg3: memref<1x128xf32, #tpu.memory_space<vmem>>, %arg4: memref<128x128xf32, #tpu.memory_space<vmem>>, %arg5: memref<1x128xf32, #tpu.memory_space<vmem>>, %arg6: memref<128x128xf32, #tpu.memory_space<vmem>>, %arg7: memref<1x128xf32, #tpu.memory_space<vmem>>, %arg8: memref<128x128xf32, #tpu.memory_space<vmem>>, %arg9: memref<1x128xf32, #tpu.memory_space<vmem>>, %arg10: memref<128x128xf32, #tpu.memory_space<vmem>>, %arg11: memref<1x128xf32, #tpu.memory_space<vmem>>, %arg12: memref<128x256xf32, #tpu.memory_space<vmem>>, %arg13: memref<1x256xf32, #tpu.memory_space<vmem>>, %arg14: memref<8x256xf32, #tpu.memory_space<vmem>>, %arg15: memref<8x64xf32, #tpu.memory_space<vmem>>) attributes {dimension_semantics = [#tpu.dimension_semantics<parallel>], iteration_bounds = array<i64: 1>, scalar_prefetch = 0 : i64, scratch_operands = 0 : i64, tpu.core_type = #tpu.core_type<tc>, window_params = [{transform_indices = @transform_0, window_bounds = array<i64: 8, 256>}, {pipeline_mode = #tpu.pipeline_mode<synchronous>, transform_indices = @transform_1, window_bounds = array<i64: 256, 128>}, {pipeline_mode = #tpu.pipeline_mode<synchronous>, transform_indices = @transform_2, window_bounds = array<i64: 1, 128>}, {pipeline_mode = #tpu.pipeline_mode<synchronous>, transform_indices = @transform_3, window_bounds = array<i64: 128, 128>}, {pipeline_mode = #tpu.pipeline_mode<synchronous>, transform_indices = @transform_4, window_bounds = array<i64: 1, 128>}, {pipeline_mode = #tpu.pipeline_mode<synchronous>, transform_indices = @transform_5, window_bounds = array<i64: 128, 128>}, {pipeline_mode = #tpu.pipeline_mode<synchronous>, transform_indices = @transform_6, window_bounds = array<i64: 1, 128>}, {pipeline_mode = #tpu.pipeline_mode<synchronous>, transform_indices = @transform_7, window_bounds = array<i64: 128, 128>}, {pipeline_mode = #tpu.pipeline_mode<synchronous>, transform_indices = @transform_8, window_bounds = array<i64: 1, 128>}, {pipeline_mode = #tpu.pipeline_mode<synchronous>, transform_indices = @transform_9, window_bounds = array<i64: 128, 128>}, {pipeline_mode = #tpu.pipeline_mode<synchronous>, transform_indices = @transform_10, window_bounds = array<i64: 1, 128>}, {pipeline_mode = #tpu.pipeline_mode<synchronous>, transform_indices = @transform_11, window_bounds = array<i64: 128, 256>}, {pipeline_mode = #tpu.pipeline_mode<synchronous>, transform_indices = @transform_12, window_bounds = array<i64: 1, 256>}, {transform_indices = @transform_13, window_bounds = array<i64: 8, 256>}, {transform_indices = @transform_14, window_bounds = array<i64: 8, 64>}]} {
    %c0 = arith.constant 0 : index
    %c0_0 = arith.constant 0 : index
    %0 = vector.load %arg1[%c0, %c0_0] : memref<8x256xf32, #tpu.memory_space<vmem>>, vector<8x256xf32>
    %c0_1 = arith.constant 0 : index
    %c0_2 = arith.constant 0 : index
    %1 = vector.load %arg2[%c0_1, %c0_2] : memref<256x128xf32, #tpu.memory_space<vmem>>, vector<256x128xf32>
    %cst = arith.constant dense<0.000000e+00> : vector<8x128xf32>
    %2 = tpu.matmul %0, %1, %cst {dimension_numbers = #tpu.dot_dimension_numbers<[1], [0], [0], [1], [0, 0, 1, 1], [], []>} : vector<8x256xf32>, vector<256x128xf32>, vector<8x128xf32> -> vector<8x128xf32>
    %c0_3 = arith.constant 0 : index
    %c0_4 = arith.constant 0 : index
    %3 = vector.load %arg3[%c0_3, %c0_4] : memref<1x128xf32, #tpu.memory_space<vmem>>, vector<1x128xf32>
    %4 = vector.broadcast %3 : vector<1x128xf32> to vector<8x128xf32>
    %5 = arith.addf %2, %4 : vector<8x128xf32>
    %cst_5 = arith.constant 0.000000e+00 : f32
    %6 = vector.broadcast %cst_5 : f32 to vector<8x128xf32>
    %7 = arith.maximumf %5, %6 : vector<8x128xf32>
    %c0_6 = arith.constant 0 : index
    %c0_7 = arith.constant 0 : index
    %8 = vector.load %arg4[%c0_6, %c0_7] : memref<128x128xf32, #tpu.memory_space<vmem>>, vector<128x128xf32>
    %cst_8 = arith.constant dense<0.000000e+00> : vector<8x128xf32>
    %9 = tpu.matmul %7, %8, %cst_8 {dimension_numbers = #tpu.dot_dimension_numbers<[1], [0], [0], [1], [0, 0, 1, 1], [], []>} : vector<8x128xf32>, vector<128x128xf32>, vector<8x128xf32> -> vector<8x128xf32>
    %c0_9 = arith.constant 0 : index
    %c0_10 = arith.constant 0 : index
    %10 = vector.load %arg5[%c0_9, %c0_10] : memref<1x128xf32, #tpu.memory_space<vmem>>, vector<1x128xf32>
    %11 = vector.broadcast %10 : vector<1x128xf32> to vector<8x128xf32>
    %12 = arith.addf %9, %11 : vector<8x128xf32>
    %cst_11 = arith.constant 0.000000e+00 : f32
    %13 = vector.broadcast %cst_11 : f32 to vector<8x128xf32>
    %14 = arith.maximumf %12, %13 : vector<8x128xf32>
    %c0_12 = arith.constant 0 : index
    %c0_13 = arith.constant 0 : index
    %15 = vector.load %arg6[%c0_12, %c0_13] : memref<128x128xf32, #tpu.memory_space<vmem>>, vector<128x128xf32>
    %cst_14 = arith.constant dense<0.000000e+00> : vector<8x128xf32>
    %16 = tpu.matmul %14, %15, %cst_14 {dimension_numbers = #tpu.dot_dimension_numbers<[1], [0], [0], [1], [0, 0, 1, 1], [], []>} : vector<8x128xf32>, vector<128x128xf32>, vector<8x128xf32> -> vector<8x128xf32>
    %c0_15 = arith.constant 0 : index
    %c0_16 = arith.constant 0 : index
    %17 = vector.load %arg7[%c0_15, %c0_16] : memref<1x128xf32, #tpu.memory_space<vmem>>, vector<1x128xf32>
    %18 = vector.broadcast %17 : vector<1x128xf32> to vector<8x128xf32>
    %19 = arith.addf %16, %18 : vector<8x128xf32>
    %20 = vector.extract_strided_slice %19 {offsets = [0, 0], sizes = [8, 64], strides = [1, 1]} : vector<8x128xf32> to vector<8x64xf32>
    %c0_17 = arith.constant 0 : index
    %c0_18 = arith.constant 0 : index
    %21 = vector.load %arg15[%c0_17, %c0_18] : memref<8x64xf32, #tpu.memory_space<vmem>>, vector<8x64xf32>
    tpu.vector_store %arg15[%c0_17, %c0_18], %20 {strides = array<i32>} : memref<8x64xf32, #tpu.memory_space<vmem>>, vector<8x64xf32>,
    %c0_19 = arith.constant 0 : index
    %c0_20 = arith.constant 0 : index
    %22 = vector.load %arg8[%c0_19, %c0_20] : memref<128x128xf32, #tpu.memory_space<vmem>>, vector<128x128xf32>
    %cst_21 = arith.constant dense<0.000000e+00> : vector<8x128xf32>
    %23 = tpu.matmul %19, %22, %cst_21 {dimension_numbers = #tpu.dot_dimension_numbers<[1], [0], [0], [1], [0, 0, 1, 1], [], []>} : vector<8x128xf32>, vector<128x128xf32>, vector<8x128xf32> -> vector<8x128xf32>
    %c0_22 = arith.constant 0 : index
    %c0_23 = arith.constant 0 : index
    %24 = vector.load %arg9[%c0_22, %c0_23] : memref<1x128xf32, #tpu.memory_space<vmem>>, vector<1x128xf32>
    %25 = vector.broadcast %24 : vector<1x128xf32> to vector<8x128xf32>
    %26 = arith.addf %23, %25 : vector<8x128xf32>
    %cst_24 = arith.constant 0.000000e+00 : f32
    %27 = vector.broadcast %cst_24 : f32 to vector<8x128xf32>
    %28 = arith.maximumf %26, %27 : vector<8x128xf32>
    %c0_25 = arith.constant 0 : index
    %c0_26 = arith.constant 0 : index
    %29 = vector.load %arg10[%c0_25, %c0_26] : memref<128x128xf32, #tpu.memory_space<vmem>>, vector<128x128xf32>
    %cst_27 = arith.constant dense<0.000000e+00> : vector<8x128xf32>
    %30 = tpu.matmul %28, %29, %cst_27 {dimension_numbers = #tpu.dot_dimension_numbers<[1], [0], [0], [1], [0, 0, 1, 1], [], []>} : vector<8x128xf32>, vector<128x128xf32>, vector<8x128xf32> -> vector<8x128xf32>
    %c0_28 = arith.constant 0 : index
    %c0_29 = arith.constant 0 : index
    %31 = vector.load %arg11[%c0_28, %c0_29] : memref<1x128xf32, #tpu.memory_space<vmem>>, vector<1x128xf32>
    %32 = vector.broadcast %31 : vector<1x128xf32> to vector<8x128xf32>
    %33 = arith.addf %30, %32 : vector<8x128xf32>
    %cst_30 = arith.constant 0.000000e+00 : f32
    %34 = vector.broadcast %cst_30 : f32 to vector<8x128xf32>
    %35 = arith.maximumf %33, %34 : vector<8x128xf32>
    %c0_31 = arith.constant 0 : index
    %c0_32 = arith.constant 0 : index
    %36 = vector.load %arg12[%c0_31, %c0_32] : memref<128x256xf32, #tpu.memory_space<vmem>>, vector<128x256xf32>
    %cst_33 = arith.constant dense<0.000000e+00> : vector<8x256xf32>
    %37 = tpu.matmul %35, %36, %cst_33 {dimension_numbers = #tpu.dot_dimension_numbers<[1], [0], [0], [1], [0, 0, 1, 1], [], []>} : vector<8x128xf32>, vector<128x256xf32>, vector<8x256xf32> -> vector<8x256xf32>
    %c0_34 = arith.constant 0 : index
    %c0_35 = arith.constant 0 : index
    %38 = vector.load %arg13[%c0_34, %c0_35] : memref<1x256xf32, #tpu.memory_space<vmem>>, vector<1x256xf32>
    %39 = vector.broadcast %38 : vector<1x256xf32> to vector<8x256xf32>
    %40 = arith.addf %37, %39 : vector<8x256xf32>
    %41 = arith.negf %40 : vector<8x256xf32>
    %42 = math.exp %41 : vector<8x256xf32>
    %cst_36 = arith.constant 1.000000e+00 : f32
    %43 = vector.broadcast %cst_36 : f32 to vector<8x256xf32>
    %44 = arith.addf %43, %42 : vector<8x256xf32>
    %45 = arith.divf %43, %44 : vector<8x256xf32>
    %c0_37 = arith.constant 0 : index
    %c0_38 = arith.constant 0 : index
    %46 = vector.load %arg14[%c0_37, %c0_38] : memref<8x256xf32, #tpu.memory_space<vmem>>, vector<8x256xf32>
    tpu.vector_store %arg14[%c0_37, %c0_38], %45 {strides = array<i32>} : memref<8x256xf32, #tpu.memory_space<vmem>>, vector<8x256xf32>,
    return
  }
  func.func @transform_0(%arg0: i32) -> (i32, i32) {
    %c0_i32 = arith.constant 0 : i32
    %c0_i32_0 = arith.constant 0 : i32
    return %arg0, %c0_i32 : i32, i32
  }
  func.func @transform_1(%arg0: i32) -> (i32, i32) {
    %c0_i32 = arith.constant 0 : i32
    %c0_i32_0 = arith.constant 0 : i32
    %c0_i32_1 = arith.constant 0 : i32
    return %c0_i32, %c0_i32_0 : i32, i32
  }
  func.func @transform_2(%arg0: i32) -> (i32, i32) {
    %c0_i32 = arith.constant 0 : i32
    %c0_i32_0 = arith.constant 0 : i32
    %c0_i32_1 = arith.constant 0 : i32
    return %c0_i32, %c0_i32_0 : i32, i32
  }
  func.func @transform_3(%arg0: i32) -> (i32, i32) {
    %c0_i32 = arith.constant 0 : i32
    %c0_i32_0 = arith.constant 0 : i32
    %c0_i32_1 = arith.constant 0 : i32
    return %c0_i32, %c0_i32_0 : i32, i32
  }
  func.func @transform_4(%arg0: i32) -> (i32, i32) {
    %c0_i32 = arith.constant 0 : i32
    %c0_i32_0 = arith.constant 0 : i32
    %c0_i32_1 = arith.constant 0 : i32
    return %c0_i32, %c0_i32_0 : i32, i32
  }
  func.func @transform_5(%arg0: i32) -> (i32, i32) {
    %c0_i32 = arith.constant 0 : i32
    %c0_i32_0 = arith.constant 0 : i32
    %c0_i32_1 = arith.constant 0 : i32
    return %c0_i32, %c0_i32_0 : i32, i32
  }
  func.func @transform_6(%arg0: i32) -> (i32, i32) {
    %c0_i32 = arith.constant 0 : i32
    %c0_i32_0 = arith.constant 0 : i32
    %c0_i32_1 = arith.constant 0 : i32
    return %c0_i32, %c0_i32_0 : i32, i32
  }
  func.func @transform_7(%arg0: i32) -> (i32, i32) {
    %c0_i32 = arith.constant 0 : i32
    %c0_i32_0 = arith.constant 0 : i32
    %c0_i32_1 = arith.constant 0 : i32
    return %c0_i32, %c0_i32_0 : i32, i32
  }
  func.func @transform_8(%arg0: i32) -> (i32, i32) {
    %c0_i32 = arith.constant 0 : i32
    %c0_i32_0 = arith.constant 0 : i32
    %c0_i32_1 = arith.constant 0 : i32
    return %c0_i32, %c0_i32_0 : i32, i32
  }
  func.func @transform_9(%arg0: i32) -> (i32, i32) {
    %c0_i32 = arith.constant 0 : i32
    %c0_i32_0 = arith.constant 0 : i32
    %c0_i32_1 = arith.constant 0 : i32
    return %c0_i32, %c0_i32_0 : i32, i32
  }
  func.func @transform_10(%arg0: i32) -> (i32, i32) {
    %c0_i32 = arith.constant 0 : i32
    %c0_i32_0 = arith.constant 0 : i32
    %c0_i32_1 = arith.constant 0 : i32
    return %c0_i32, %c0_i32_0 : i32, i32
  }
  func.func @transform_11(%arg0: i32) -> (i32, i32) {
    %c0_i32 = arith.constant 0 : i32
    %c0_i32_0 = arith.constant 0 : i32
    %c0_i32_1 = arith.constant 0 : i32
    return %c0_i32, %c0_i32_0 : i32, i32
  }
  func.func @transform_12(%arg0: i32) -> (i32, i32) {
    %c0_i32 = arith.constant 0 : i32
    %c0_i32_0 = arith.constant 0 : i32
    %c0_i32_1 = arith.constant 0 : i32
    return %c0_i32, %c0_i32_0 : i32, i32
  }
  func.func @transform_13(%arg0: i32) -> (i32, i32) {
    %c0_i32 = arith.constant 0 : i32
    %c0_i32_0 = arith.constant 0 : i32
    return %arg0, %c0_i32 : i32, i32
  }
  func.func @transform_14(%arg0: i32) -> (i32, i32) {
    %c0_i32 = arith.constant 0 : i32
    %c0_i32_0 = arith.constant 0 : i32
    return %arg0, %c0_i32 : i32, i32
  }
}

module attributes {stable_mosaic.version = 11 : i64} {
  func.func @vade_fwd_kernel(%arg0: i32, %arg1: memref<8x256xf32, #tpu.memory_space<vmem>>, %arg2: memref<256x128xf32, #tpu.memory_space<vmem>>, %arg3: memref<1x128xf32, #tpu.memory_space<vmem>>, %arg4: memref<128x128xf32, #tpu.memory_space<vmem>>, %arg5: memref<1x128xf32, #tpu.memory_space<vmem>>, %arg6: memref<128x128xf32, #tpu.memory_space<vmem>>, %arg7: memref<1x128xf32, #tpu.memory_space<vmem>>, %arg8: memref<128x128xf32, #tpu.memory_space<vmem>>, %arg9: memref<1x128xf32, #tpu.memory_space<vmem>>, %arg10: memref<128x128xf32, #tpu.memory_space<vmem>>, %arg11: memref<1x128xf32, #tpu.memory_space<vmem>>, %arg12: memref<128x256xf32, #tpu.memory_space<vmem>>, %arg13: memref<1x256xf32, #tpu.memory_space<vmem>>, %arg14: memref<8x256xf32, #tpu.memory_space<vmem>>, %arg15: memref<8x64xf32, #tpu.memory_space<vmem>>) attributes {dimension_semantics = [#tpu.dimension_semantics<parallel>], iteration_bounds = array<i64: 1>, scalar_prefetch = 0 : i64, scratch_operands = 0 : i64, tpu.core_type = #tpu.core_type<tc>, window_params = [{transform_indices = @transform_0, window_bounds = array<i64: 8, 256>}, {pipeline_mode = #tpu.pipeline_mode<synchronous>, transform_indices = @transform_1, window_bounds = array<i64: 256, 128>}, {pipeline_mode = #tpu.pipeline_mode<synchronous>, transform_indices = @transform_2, window_bounds = array<i64: 1, 128>}, {pipeline_mode = #tpu.pipeline_mode<synchronous>, transform_indices = @transform_3, window_bounds = array<i64: 128, 128>}, {pipeline_mode = #tpu.pipeline_mode<synchronous>, transform_indices = @transform_4, window_bounds = array<i64: 1, 128>}, {pipeline_mode = #tpu.pipeline_mode<synchronous>, transform_indices = @transform_5, window_bounds = array<i64: 128, 128>}, {pipeline_mode = #tpu.pipeline_mode<synchronous>, transform_indices = @transform_6, window_bounds = array<i64: 1, 128>}, {pipeline_mode = #tpu.pipeline_mode<synchronous>, transform_indices = @transform_7, window_bounds = array<i64: 128, 128>}, {pipeline_mode = #tpu.pipeline_mode<synchronous>, transform_indices = @transform_8, window_bounds = array<i64: 1, 128>}, {pipeline_mode = #tpu.pipeline_mode<synchronous>, transform_indices = @transform_9, window_bounds = array<i64: 128, 128>}, {pipeline_mode = #tpu.pipeline_mode<synchronous>, transform_indices = @transform_10, window_bounds = array<i64: 1, 128>}, {pipeline_mode = #tpu.pipeline_mode<synchronous>, transform_indices = @transform_11, window_bounds = array<i64: 128, 256>}, {pipeline_mode = #tpu.pipeline_mode<synchronous>, transform_indices = @transform_12, window_bounds = array<i64: 1, 256>}, {transform_indices = @transform_13, window_bounds = array<i64: 8, 256>}, {transform_indices = @transform_14, window_bounds = array<i64: 8, 64>}]} {
    %c0 = arith.constant 0 : index
    %c0_0 = arith.constant 0 : index
    %0 = vector.load %arg1[%c0, %c0_0] : memref<8x256xf32, #tpu.memory_space<vmem>>, vector<8x256xf32>
    %c0_1 = arith.constant 0 : index
    %c0_2 = arith.constant 0 : index
    %1 = vector.load %arg2[%c0_1, %c0_2] : memref<256x128xf32, #tpu.memory_space<vmem>>, vector<256x128xf32>
    %cst = arith.constant dense<0.000000e+00> : vector<8x128xf32>
    %2 = tpu.matmul %0, %1, %cst {dimension_numbers = #tpu.dot_dimension_numbers<[1], [0], [0], [1], [0, 0, 1, 1], [], []>} : vector<8x256xf32>, vector<256x128xf32>, vector<8x128xf32> -> vector<8x128xf32>
    %c0_3 = arith.constant 0 : index
    %c0_4 = arith.constant 0 : index
    %3 = vector.load %arg3[%c0_3, %c0_4] : memref<1x128xf32, #tpu.memory_space<vmem>>, vector<1x128xf32>
    %4 = vector.broadcast %3 : vector<1x128xf32> to vector<8x128xf32>
    %5 = arith.addf %2, %4 : vector<8x128xf32>
    %cst_5 = arith.constant 0.000000e+00 : f32
    %6 = vector.broadcast %cst_5 : f32 to vector<8x128xf32>
    %7 = arith.maximumf %5, %6 : vector<8x128xf32>
    %c0_6 = arith.constant 0 : index
    %c0_7 = arith.constant 0 : index
    %8 = vector.load %arg4[%c0_6, %c0_7] : memref<128x128xf32, #tpu.memory_space<vmem>>, vector<128x128xf32>
    %cst_8 = arith.constant dense<0.000000e+00> : vector<8x128xf32>
    %9 = tpu.matmul %7, %8, %cst_8 {dimension_numbers = #tpu.dot_dimension_numbers<[1], [0], [0], [1], [0, 0, 1, 1], [], []>} : vector<8x128xf32>, vector<128x128xf32>, vector<8x128xf32> -> vector<8x128xf32>
    %c0_9 = arith.constant 0 : index
    %c0_10 = arith.constant 0 : index
    %10 = vector.load %arg5[%c0_9, %c0_10] : memref<1x128xf32, #tpu.memory_space<vmem>>, vector<1x128xf32>
    %11 = vector.broadcast %10 : vector<1x128xf32> to vector<8x128xf32>
    %12 = arith.addf %9, %11 : vector<8x128xf32>
    %cst_11 = arith.constant 0.000000e+00 : f32
    %13 = vector.broadcast %cst_11 : f32 to vector<8x128xf32>
    %14 = arith.maximumf %12, %13 : vector<8x128xf32>
    %c0_12 = arith.constant 0 : index
    %c0_13 = arith.constant 0 : index
    %15 = vector.load %arg6[%c0_12, %c0_13] : memref<128x128xf32, #tpu.memory_space<vmem>>, vector<128x128xf32>
    %cst_14 = arith.constant dense<0.000000e+00> : vector<8x128xf32>
    %16 = tpu.matmul %14, %15, %cst_14 {dimension_numbers = #tpu.dot_dimension_numbers<[1], [0], [0], [1], [0, 0, 1, 1], [], []>} : vector<8x128xf32>, vector<128x128xf32>, vector<8x128xf32> -> vector<8x128xf32>
    %c0_15 = arith.constant 0 : index
    %c0_16 = arith.constant 0 : index
    %17 = vector.load %arg7[%c0_15, %c0_16] : memref<1x128xf32, #tpu.memory_space<vmem>>, vector<1x128xf32>
    %18 = vector.broadcast %17 : vector<1x128xf32> to vector<8x128xf32>
    %19 = arith.addf %16, %18 : vector<8x128xf32>
    %20 = vector.extract_strided_slice %19 {offsets = [0, 0], sizes = [8, 64], strides = [1, 1]} : vector<8x128xf32> to vector<8x64xf32>
    %c0_17 = arith.constant 0 : index
    %c0_18 = arith.constant 0 : index
    %21 = vector.load %arg15[%c0_17, %c0_18] : memref<8x64xf32, #tpu.memory_space<vmem>>, vector<8x64xf32>
    tpu.vector_store %arg15[%c0_17, %c0_18], %20 {strides = array<i32>} : memref<8x64xf32, #tpu.memory_space<vmem>>, vector<8x64xf32>,
    %c0_19 = arith.constant 0 : index
    %c0_20 = arith.constant 0 : index
    %22 = vector.load %arg8[%c0_19, %c0_20] : memref<128x128xf32, #tpu.memory_space<vmem>>, vector<128x128xf32>
    %cst_21 = arith.constant dense<0.000000e+00> : vector<8x128xf32>
    %23 = tpu.matmul %19, %22, %cst_21 {dimension_numbers = #tpu.dot_dimension_numbers<[1], [0], [0], [1], [0, 0, 1, 1], [], []>} : vector<8x128xf32>, vector<128x128xf32>, vector<8x128xf32> -> vector<8x128xf32>
    %c0_22 = arith.constant 0 : index
    %c0_23 = arith.constant 0 : index
    %24 = vector.load %arg9[%c0_22, %c0_23] : memref<1x128xf32, #tpu.memory_space<vmem>>, vector<1x128xf32>
    %25 = vector.broadcast %24 : vector<1x128xf32> to vector<8x128xf32>
    %26 = arith.addf %23, %25 : vector<8x128xf32>
    %cst_24 = arith.constant 0.000000e+00 : f32
    %27 = vector.broadcast %cst_24 : f32 to vector<8x128xf32>
    %28 = arith.maximumf %26, %27 : vector<8x128xf32>
    %c0_25 = arith.constant 0 : index
    %c0_26 = arith.constant 0 : index
    %29 = vector.load %arg10[%c0_25, %c0_26] : memref<128x128xf32, #tpu.memory_space<vmem>>, vector<128x128xf32>
    %cst_27 = arith.constant dense<0.000000e+00> : vector<8x128xf32>
    %30 = tpu.matmul %28, %29, %cst_27 {dimension_numbers = #tpu.dot_dimension_numbers<[1], [0], [0], [1], [0, 0, 1, 1], [], []>} : vector<8x128xf32>, vector<128x128xf32>, vector<8x128xf32> -> vector<8x128xf32>
    %c0_28 = arith.constant 0 : index
    %c0_29 = arith.constant 0 : index
    %31 = vector.load %arg11[%c0_28, %c0_29] : memref<1x128xf32, #tpu.memory_space<vmem>>, vector<1x128xf32>
    %32 = vector.broadcast %31 : vector<1x128xf32> to vector<8x128xf32>
    %33 = arith.addf %30, %32 : vector<8x128xf32>
    %cst_30 = arith.constant 0.000000e+00 : f32
    %34 = vector.broadcast %cst_30 : f32 to vector<8x128xf32>
    %35 = arith.maximumf %33, %34 : vector<8x128xf32>
    %c0_31 = arith.constant 0 : index
    %c0_32 = arith.constant 0 : index
    %36 = vector.load %arg12[%c0_31, %c0_32] : memref<128x256xf32, #tpu.memory_space<vmem>>, vector<128x256xf32>
    %cst_33 = arith.constant dense<0.000000e+00> : vector<8x256xf32>
    %37 = tpu.matmul %35, %36, %cst_33 {dimension_numbers = #tpu.dot_dimension_numbers<[1], [0], [0], [1], [0, 0, 1, 1], [], []>} : vector<8x128xf32>, vector<128x256xf32>, vector<8x256xf32> -> vector<8x256xf32>
    %c0_34 = arith.constant 0 : index
    %c0_35 = arith.constant 0 : index
    %38 = vector.load %arg13[%c0_34, %c0_35] : memref<1x256xf32, #tpu.memory_space<vmem>>, vector<1x256xf32>
    %39 = vector.broadcast %38 : vector<1x256xf32> to vector<8x256xf32>
    %40 = arith.addf %37, %39 : vector<8x256xf32>
    %41 = arith.negf %40 : vector<8x256xf32>
    %42 = math.exp %41 : vector<8x256xf32>
    %cst_36 = arith.constant 1.000000e+00 : f32
    %43 = vector.broadcast %cst_36 : f32 to vector<8x256xf32>
    %44 = arith.addf %43, %42 : vector<8x256xf32>
    %45 = arith.divf %43, %44 : vector<8x256xf32>
    %c0_37 = arith.constant 0 : index
    %c0_38 = arith.constant 0 : index
    %46 = vector.load %arg14[%c0_37, %c0_38] : memref<8x256xf32, #tpu.memory_space<vmem>>, vector<8x256xf32>
    tpu.vector_store %arg14[%c0_37, %c0_38], %45 {strides = array<i32>} : memref<8x256xf32, #tpu.memory_space<vmem>>, vector<8x256xf32>,
    return
  }
  func.func @transform_0(%arg0: i32) -> (i32, i32) {
    %c0_i32 = arith.constant 0 : i32
    %c0_i32_0 = arith.constant 0 : i32
    return %arg0, %c0_i32 : i32, i32
  }
  func.func @transform_1(%arg0: i32) -> (i32, i32) {
    %c0_i32 = arith.constant 0 : i32
    %c0_i32_0 = arith.constant 0 : i32
    %c0_i32_1 = arith.constant 0 : i32
    return %c0_i32, %c0_i32_0 : i32, i32
  }
  func.func @transform_2(%arg0: i32) -> (i32, i32) {
    %c0_i32 = arith.constant 0 : i32
    %c0_i32_0 = arith.constant 0 : i32
    %c0_i32_1 = arith.constant 0 : i32
    return %c0_i32, %c0_i32_0 : i32, i32
  }
  func.func @transform_3(%arg0: i32) -> (i32, i32) {
    %c0_i32 = arith.constant 0 : i32
    %c0_i32_0 = arith.constant 0 : i32
    %c0_i32_1 = arith.constant 0 : i32
    return %c0_i32, %c0_i32_0 : i32, i32
  }
  func.func @transform_4(%arg0: i32) -> (i32, i32) {
    %c0_i32 = arith.constant 0 : i32
    %c0_i32_0 = arith.constant 0 : i32
    %c0_i32_1 = arith.constant 0 : i32
    return %c0_i32, %c0_i32_0 : i32, i32
  }
  func.func @transform_5(%arg0: i32) -> (i32, i32) {
    %c0_i32 = arith.constant 0 : i32
    %c0_i32_0 = arith.constant 0 : i32
    %c0_i32_1 = arith.constant 0 : i32
    return %c0_i32, %c0_i32_0 : i32, i32
  }
  func.func @transform_6(%arg0: i32) -> (i32, i32) {
    %c0_i32 = arith.constant 0 : i32
    %c0_i32_0 = arith.constant 0 : i32
    %c0_i32_1 = arith.constant 0 : i32
    return %c0_i32, %c0_i32_0 : i32, i32
  }
  func.func @transform_7(%arg0: i32) -> (i32, i32) {
    %c0_i32 = arith.constant 0 : i32
    %c0_i32_0 = arith.constant 0 : i32
    %c0_i32_1 = arith.constant 0 : i32
    return %c0_i32, %c0_i32_0 : i32, i32
  }
  func.func @transform_8(%arg0: i32) -> (i32, i32) {
    %c0_i32 = arith.constant 0 : i32
    %c0_i32_0 = arith.constant 0 : i32
    %c0_i32_1 = arith.constant 0 : i32
    return %c0_i32, %c0_i32_0 : i32, i32
  }
  func.func @transform_9(%arg0: i32) -> (i32, i32) {
    %c0_i32 = arith.constant 0 : i32
    %c0_i32_0 = arith.constant 0 : i32
    %c0_i32_1 = arith.constant 0 : i32
    return %c0_i32, %c0_i32_0 : i32, i32
  }
  func.func @transform_10(%arg0: i32) -> (i32, i32) {
    %c0_i32 = arith.constant 0 : i32
    %c0_i32_0 = arith.constant 0 : i32
    %c0_i32_1 = arith.constant 0 : i32
    return %c0_i32, %c0_i32_0 : i32, i32
  }
  func.func @transform_11(%arg0: i32) -> (i32, i32) {
    %c0_i32 = arith.constant 0 : i32
    %c0_i32_0 = arith.constant 0 : i32
    %c0_i32_1 = arith.constant 0 : i32
    return %c0_i32, %c0_i32_0 : i32, i32
  }
  func.func @transform_12(%arg0: i32) -> (i32, i32) {
    %c0_i32 = arith.constant 0 : i32
    %c0_i32_0 = arith.constant 0 : i32
    %c0_i32_1 = arith.constant 0 : i32
    return %c0_i32, %c0_i32_0 : i32, i32
  }
  func.func @transform_13(%arg0: i32) -> (i32, i32) {
    %c0_i32 = arith.constant 0 : i32
    %c0_i32_0 = arith.constant 0 : i32
    return %arg0, %c0_i32 : i32, i32
  }
  func.func @transform_14(%arg0: i32) -> (i32, i32) {
    %c0_i32 = arith.constant 0 : i32
    %c0_i32_0 = arith.constant 0 : i32
    return %arg0, %c0_i32 : i32, i32
  }
}

</mosaic_0001>

<bundles_post_ra>
// kernel: tpu_custom_call.1
= control target key start
LH: loop header
LB: loop body
LE: loop exit
PB: predicated region body
PF: predicated region fallthrough
CT: control target
= control target key end

     0   :  { %20 = vsyncpa [#allocation3], 0  ;;  %s1708_s0 = inlined_call_operand.hbm [shape: f32[8,256], index: 0, kind: input, shape index: {}]   ;;  %s1709_s1 = inlined_call_operand.hbm [shape: f32[256,128], index: 1, kind: input, shape index: {}]   ;;  %s1710_s2 = inlined_call_operand.vmem [shape: f32[1,128], index: 2, kind: input, shape index: {}]   ;;  %s1711_s3 = inlined_call_operand.hbm [shape: f32[128,128], index: 3, kind: input, shape index: {}]   ;;  %s1712_s4 = inlined_call_operand.vmem [shape: f32[1,128], index: 4, kind: input, shape index: {}]   ;;  %s1713_s5 = inlined_call_operand.hbm [shape: f32[128,128], index: 5, kind: input, shape index: {}]   ;;  %s1714_s6 = inlined_call_operand.vmem [shape: f32[1,128], index: 6, kind: input, shape index: {}]   ;;  %s1715_s7 = inlined_call_operand.hbm [shape: f32[128,128], index: 7, kind: input, shape index: {}]   ;;  %s1716_s8 = inlined_call_operand.vmem [shape: f32[1,128], index: 8, kind: input, shape index: {}]   ;;  %s1717_s9 = inlined_call_operand.hbm [shape: f32[128,128], index: 9, kind: input, shape index: {}]   ;;  %s1718_s10 = inlined_call_operand.vmem [shape: f32[1,128], index: 10, kind: input, shape index: {}]   ;;  %s1719_s11 = inlined_call_operand.hbm [shape: f32[128,256], index: 11, kind: input, shape index: {}]   ;;  %s1720_s12 = inlined_call_operand.vmem [shape: f32[1,256], index: 12, kind: input, shape index: {}]   ;;  %s1721_s13 = inlined_call_operand.hbm [shape: f32[8,256], index: 13, kind: output, shape index: {0}]   ;;  %s1722_s14 = inlined_call_operand.hbm [shape: f32[8,64], index: 14, kind: output, shape index: {1}]  }
   0x1   :  { %21 = vsyncpa [#allocation6], 0 }
   0x2   :  { %22 = vsyncpa [#allocation9], 0 }
   0x3   :  { %23 = vsyncpa [#allocation12], 0 }
   0x4   :  { %24 = vsyncpa [#allocation4], 0 }
   0x5   :  { %25 = vsyncpa [#allocation16], 0  ;;  %s1435_s29 = smov [#allocation5]   ;;  %s1225_s17 = scalar_lea.hbm %s1709_s1, 4096 }
   0x6   :  { %s41_s30 = sshll.u32 %s1435_s29, 4  ;;  %p1226_p0 = scmp.ne.s32.totalorder %s1709_s1, %s1225_s17  ;;  %s42_s30 = int_to_ptr.vmem [resolvable:$true] %s41_s30 }
   0x7   :  { %p1229_p1 = scmp.lt.u32.totalorder %s1225_s17, %s1709_s1 }
   0x9   :  { %p1231_p2 = pnand %p1229_p1, %p1226_p0 }
   0xb   :  { %1234 = shalt.err (!%p1231_p2)
}
   0xc   :  { %s1235_s22 = scalar_lea.vmem %s42_s30, 4096  ;;  %p1240_p4 = scmp.lt.s32.totalorder %s42_s30, %s42_s30 }
   0xd   :  { %p1236_p3 = scmp.ne.s32.totalorder %s42_s30, %s1235_s22  ;;  %p1241_p5 = scmp.lt.s32.totalorder %s1235_s22, %s1235_s22 }
   0xf   :  { %p1242_p6 = por %p1241_p5, %p1240_p4 }
  0x11   :  { %p1243_p7 = pnand %p1242_p6, %p1236_p3 }
  0x13   :  { %1246 = shalt.err (!%p1243_p7)
}
  0x14   :  { %s1436_s23 = smov 128   ;;  %s1437_s24 = smov 8  }
  0x15   :  { %47 = dma.hbm_to_vmem [thread:$0]  %s1709_s1, 4096, %s42_s30, [#allocation6], %s1436_s23, %s1436_s23, %s1437_s24  }
  0x16   :  { %s1438_s27 = smov [#allocation8]   ;;  %s1439_s29 = smov [#allocation11]  }
  0x17   :  { %s69_s28 = sshll.u32 %s1438_s27, 4  ;;  %s97_s15 = sshll.u32 %s1439_s29, 4  ;;  %s70_s28 = int_to_ptr.vmem [resolvable:$true] %s69_s28  ;;  %s98_s15 = int_to_ptr.vmem [resolvable:$true] %s97_s15 }
  0x18   :  { %s1247_s18 = scalar_lea.hbm %s1713_s5, 2048 }
  0x19   :  { %p1248_p8 = scmp.ne.s32.totalorder %s1713_s5, %s1247_s18  ;;  %p1251_p9 = scmp.lt.u32.totalorder %s1247_s18, %s1713_s5 }
  0x1b   :  { %p1253_p10 = pnand %p1251_p9, %p1248_p8 }
  0x1d   :  { %1256 = shalt.err (!%p1253_p10)
}
  0x1e   :  { %s1257_s1 = scalar_lea.vmem %s70_s28, 2048  ;;  %p1262_p12 = scmp.lt.s32.totalorder %s70_s28, %s70_s28 }
  0x1f   :  { %p1258_p11 = scmp.ne.s32.totalorder %s70_s28, %s1257_s1  ;;  %p1263_p13 = scmp.lt.s32.totalorder %s1257_s1, %s1257_s1 }
  0x21   :  { %p1264_p0 = por %p1263_p13, %p1262_p12 }
  0x23   :  { %p1265_p1 = pnand %p1264_p0, %p1258_p11 }
  0x25   :  { %1268 = shalt.err (!%p1265_p1)
}
  0x26   :  { %75 = dma.hbm_to_vmem [thread:$0]  %s1713_s5, 2048, %s70_s28, [#allocation9], %s1436_s23, %s1436_s23, %s1437_s24  }
  0x27   :  { %s1269_s29 = scalar_lea.hbm %s1717_s9, 2048 }
  0x28   :  { %p1270_p2 = scmp.ne.s32.totalorder %s1717_s9, %s1269_s29  ;;  %p1273_p3 = scmp.lt.u32.totalorder %s1269_s29, %s1717_s9 }
  0x2a   :  { %p1275_p4 = pnand %p1273_p3, %p1270_p2 }
  0x2c   :  { %1278 = shalt.err (!%p1275_p4)
}
  0x2d   :  { %s1279_s20 = scalar_lea.vmem %s98_s15, 2048  ;;  %p1284_p6 = scmp.lt.s32.totalorder %s98_s15, %s98_s15 }
  0x2e   :  { %p1280_p5 = scmp.ne.s32.totalorder %s98_s15, %s1279_s20  ;;  %p1285_p7 = scmp.lt.s32.totalorder %s1279_s20, %s1279_s20 }
  0x30   :  { %p1286_p8 = por %p1285_p7, %p1284_p6 }
  0x32   :  { %p1287_p9 = pnand %p1286_p8, %p1280_p5 }
  0x34   :  { %1290 = shalt.err (!%p1287_p9)
}
  0x35   :  { %103 = dma.hbm_to_vmem [thread:$0]  %s1717_s9, 2048, %s98_s15, [#allocation12], %s1436_s23, %s1436_s23, %s1437_s24  }
  0x36   :  { %s1440_s21 = smov [#allocation2]   ;;  %s1441_s1 = smov [#allocation7]  }
  0x37   :  { %s32_s22 = sshll.u32 %s1440_s21, 4  ;;  %s55_s30 = sshll.u32 %s1441_s1, 4  ;;  %s33_s22 = int_to_ptr.vmem [resolvable:$true] %s32_s22  ;;  %s56_s30 = int_to_ptr.vmem [resolvable:$true] %s55_s30 }
  0x38   :  { %s1291_s27 = scalar_lea.hbm %s1708_s0, 256 }
  0x39   :  { %p1292_p10 = scmp.ne.s32.totalorder %s1708_s0, %s1291_s27  ;;  %p1295_p11 = scmp.lt.u32.totalorder %s1291_s27, %s1708_s0 }
  0x3b   :  { %p1297_p12 = pnand %p1295_p11, %p1292_p10 }
  0x3d   :  { %1300 = shalt.err (!%p1297_p12)
}
  0x3e   :  { %s1301_s9 = scalar_lea.vmem %s33_s22, 256  ;;  %p1306_p0 = scmp.lt.s32.totalorder %s33_s22, %s33_s22 }
  0x3f   :  { %p1302_p13 = scmp.ne.s32.totalorder %s33_s22, %s1301_s9  ;;  %p1307_p1 = scmp.lt.s32.totalorder %s1301_s9, %s1301_s9 }
  0x41   :  { %p1308_p2 = por %p1307_p1, %p1306_p0 }
  0x43   :  { %p1309_p3 = pnand %p1308_p2, %p1302_p13 }
  0x45   :  { %1312 = shalt.err (!%p1309_p3)
}
  0x46   :  { %35 = dma.hbm_to_vmem [thread:$0]  %s1708_s0, 256, %s33_s22, [#allocation3]  }
  0x47   :  { %s1313_s28 = scalar_lea.hbm %s1711_s3, 2048 }
  0x48   :  { %p1314_p4 = scmp.ne.s32.totalorder %s1711_s3, %s1313_s28  ;;  %p1317_p5 = scmp.lt.u32.totalorder %s1313_s28, %s1711_s3 }
  0x4a   :  { %p1319_p6 = pnand %p1317_p5, %p1314_p4 }
  0x4c   :  { %1322 = shalt.err (!%p1319_p6)
}
  0x4d   :  { %s1323_s27 = scalar_lea.vmem %s56_s30, 2048  ;;  %p1328_p8 = scmp.lt.s32.totalorder %s56_s30, %s56_s30 }
  0x4e   :  { %p1324_p7 = scmp.ne.s32.totalorder %s56_s30, %s1323_s27  ;;  %p1329_p9 = scmp.lt.s32.totalorder %s1323_s27, %s1323_s27 }
  0x50   :  { %p1330_p10 = por %p1329_p9, %p1328_p8 }
  0x52   :  { %p1331_p11 = pnand %p1330_p10, %p1324_p7 }
  0x54   :  { %1334 = shalt.err (!%p1331_p11)
}
  0x55   :  { %61 = dma.hbm_to_vmem [thread:$0]  %s1711_s3, 2048, %s56_s30, [#allocation6], %s1436_s23, %s1436_s23, %s1437_s24  }
  0x56   :  { %s1442_s29 = smov [#allocation10]   ;;  %s1443_s17 = smov [#allocation13]  }
  0x57   :  { %s83_s16 = sshll.u32 %s1442_s29, 4  ;;  %s111_s18 = sshll.u32 %s1443_s17, 4  ;;  %s84_s16 = int_to_ptr.vmem [resolvable:$true] %s83_s16  ;;  %s112_s18 = int_to_ptr.vmem [resolvable:$true] %s111_s18 }
  0x58   :  { %s1335_s19 = scalar_lea.hbm %s1715_s7, 2048 }
  0x59   :  { %p1336_p12 = scmp.ne.s32.totalorder %s1715_s7, %s1335_s19  ;;  %p1339_p13 = scmp.lt.u32.totalorder %s1335_s19, %s1715_s7 }
  0x5b   :  { %p1341_p0 = pnand %p1339_p13, %p1336_p12 }
  0x5d   :  { %1344 = shalt.err (!%p1341_p0)
}
  0x5e   :  { %s1345_s3 = scalar_lea.vmem %s84_s16, 2048  ;;  %p1350_p2 = scmp.lt.s32.totalorder %s84_s16, %s84_s16 }
  0x5f   :  { %p1346_p1 = scmp.ne.s32.totalorder %s84_s16, %s1345_s3  ;;  %p1351_p3 = scmp.lt.s32.totalorder %s1345_s3, %s1345_s3 }
  0x61   :  { %p1352_p4 = por %p1351_p3, %p1350_p2 }
  0x63   :  { %p1353_p5 = pnand %p1352_p4, %p1346_p1 }
  0x65   :  { %1356 = shalt.err (!%p1353_p5)
}
  0x66   :  { %89 = dma.hbm_to_vmem [thread:$0]  %s1715_s7, 2048, %s84_s16, [#allocation9], %s1436_s23, %s1436_s23, %s1437_s24  }
  0x67   :  { %s1357_s27 = scalar_lea.hbm %s1719_s11, 4096 }
  0x68   :  { %p1358_p6 = scmp.ne.s32.totalorder %s1719_s11, %s1357_s27  ;;  %p1361_p7 = scmp.lt.u32.totalorder %s1357_s27, %s1719_s11 }
  0x6a   :  { %p1363_p8 = pnand %p1361_p7, %p1358_p6 }
  0x6c   :  { %1366 = shalt.err (!%p1363_p8)
}
  0x6d   :  { %s1367_s9 = scalar_lea.vmem %s112_s18, 4096  ;;  %p1372_p10 = scmp.lt.s32.totalorder %s112_s18, %s112_s18 }
  0x6e   :  { %p1368_p9 = scmp.ne.s32.totalorder %s112_s18, %s1367_s9  ;;  %p1373_p11 = scmp.lt.s32.totalorder %s1367_s9, %s1367_s9 }
  0x70   :  { %p1374_p12 = por %p1373_p11, %p1372_p10 }
  0x72   :  { %p1375_p13 = pnand %p1374_p12, %p1368_p9 }
  0x74   :  { %1378 = shalt.err (!%p1375_p13)
}
  0x75   :  { %s1444_s7 = smov 256   ;;  %s1445_s23 = smov 16  }
  0x76   :  { %117 = dma.hbm_to_vmem [thread:$0]  %s1719_s11, 4096, %s112_s18, [#allocation12], %s1444_s7, %s1444_s7, %s1445_s23  }
  0x77   :  { %1423 = dma.done.wait [#allocation3], 256  }
  0x78   :  { %1424 = vsyncadd [#allocation3], 4294967040 }
  0x79   :  { %1425 = dma.done.wait [#allocation6], 6144  }
  0x7a   :  { %1426 = vsyncadd [#allocation6], 4294961152 }
  0x7b   :  { %1427 = dma.done.wait [#allocation9], 4096  }
  0x7c   :  { %1428 = vsyncadd [#allocation9], 4294963200 }
  0x7d   :  { %1429 = dma.done.wait [#allocation12], 6144  }
  0x7e   :  { %1430 = vsyncadd [#allocation12], 4294961152  ;;  %v1446_v0 = vmov 0.0|0.0   ;;  %v159_v1 = vld [vmem:[#allocation5 + $0x80] sm:$0xff]  ;;  %v160_v2 = vld [vmem:[#allocation5 + $0x88] sm:$0xff]  ;;  %vm1447_vm0 = vmmov 0  }
  0x7f   :  { %1073 = vmatprep.subr.bf16.mxu1 %v1446_v0  ;;  %v143_v3 = vld [vmem:[#allocation5] sm:$0xff]  ;;  %v1041_v4 = vpack.c.bf16 %v160_v2, %v159_v1  ;;  %v144_v5 = vld [vmem:[#allocation5 + $0x8] sm:$0xff]  ;;  %v161_v6 = vld [vmem:[#allocation5 + $0x90] sm:$0xff]  ;;  %vm440_vm1 = vcmask 523264  }
  0x80   :  { %v162_v7 = vld [vmem:[#allocation5 + $0x98] sm:$0xff]  ;;  %v1043_v8 = vpack.c.bf16 %v144_v5, %v143_v3  ;;  %v145_v10 = vld [vmem:[#allocation5 + $0x10] sm:$0xff]  ;;  %v163_v12 = vld [vmem:[#allocation5 + $0xa0] sm:$0xff] }
  0x81   :  { %v1045_v9 = vpack.c.bf16 %v162_v7, %v161_v6  ;;  %v146_v11 = vld [vmem:[#allocation5 + $0x18] sm:$0xff]  ;;  %1042 = vmatprep.subr.bf16.mxu0 %v1041_v4  ;;  %v164_v13 = vld [vmem:[#allocation5 + $0xa8] sm:$0xff]  ;;  %v147_v16 = vld [vmem:[#allocation5 + $0x20] sm:$0xff] }
  0x82   :  { %1044 = vmatpush3.bf16.msra.mxu0 %v1043_v8  ;;  %v1047_v14 = vpack.c.bf16 %v146_v11, %v145_v10  ;;  %v1049_v15 = vpack.c.bf16 %v164_v13, %v163_v12  ;;  %v148_v17 = vld [vmem:[#allocation5 + $0x28] sm:$0xff]  ;;  %v165_v18 = vld [vmem:[#allocation5 + $0xb0] sm:$0xff]  ;;  %v166_v19 = vld [vmem:[#allocation5 + $0xb8] sm:$0xff]  ;;  %v1448_v12 = vmov 0.0  }
  0x83   :  { %1046 = vmatprep.subr.bf16.mxu0 %v1045_v9  ;;  %v1051_v20 = vpack.c.bf16 %v148_v17, %v147_v16  ;;  %v1053_v21 = vpack.c.bf16 %v166_v19, %v165_v18  ;;  %v149_v22 = vld [vmem:[#allocation5 + $0x30] sm:$0xff]  ;;  %v150_v23 = vld [vmem:[#allocation5 + $0x38] sm:$0xff]  ;;  %v167_v24 = vld [vmem:[#allocation5 + $0xc0] sm:$0xff]  ;;  %933 = vmatprep.mubr.msk.f32.mxu1 %vm1447_vm0, %v1448_v12 }
  0x84   :  { %v168_v25 = vld [vmem:[#allocation5 + $0xc8] sm:$0xff]  ;;  %v142_v26 = vld [vmem:[#allocation2 + $0x8] sm:$0xff]  ;;  %v253_v27 = vld [vmem:[#allocation7] sm:$0xff]  ;;  %v1055_v29 = vpack.c.bf16 %v150_v23, %v149_v22 }
  0x85   :  { %246 = vmatprep.mubr.f32.mxu0 %v142_v26  ;;  %v254_v28 = vld [vmem:[#allocation7 + $0x8] sm:$0xff]  ;;  %v255_v31 = vld [vmem:[#allocation7 + $0x10] sm:$0xff]  ;;  %v256_v32 = vld [vmem:[#allocation7 + $0x18] sm:$0xff]  ;;  %v1057_v33 = vpack.c.bf16 %v168_v25, %v167_v24 }
  0x86   :  { %1048 = vmatpush3.bf16.msra.mxu0 %v1047_v14  ;;  %v1074_v30 = vpack.c.bf16 %v254_v28, %v253_v27  ;;  %v151_v34 = vld [vmem:[#allocation5 + $0x40] sm:$0xff]  ;;  %v152_v35 = vld [vmem:[#allocation5 + $0x48] sm:$0xff]  ;;  %v169_v36 = vld [vmem:[#allocation5 + $0xd0] sm:$0xff]  ;;  %v1077_v38 = vpack.c.bf16 %v256_v32, %v255_v31 }
  0x87   :  { %1050 = vmatprep.subr.bf16.mxu0 %v1049_v15  ;;  %v170_v37 = vld [vmem:[#allocation5 + $0xd8] sm:$0xff]  ;;  %v257_v39 = vld [vmem:[#allocation7 + $0x20] sm:$0xff]  ;;  %v258_v40 = vld [vmem:[#allocation7 + $0x28] sm:$0xff]  ;;  %v1059_v41 = vpack.c.bf16 %v152_v35, %v151_v34 }
  0x88   :  { %1075 = vmatpush3.bf16.msra.mxu1 %v1074_v30  ;;  %v1061_v42 = vpack.c.bf16 %v170_v37, %v169_v36  ;;  %v153_v43 = vld [vmem:[#allocation5 + $0x50] sm:$0xff]  ;;  %v154_v44 = vld [vmem:[#allocation5 + $0x58] sm:$0xff]  ;;  %v171_v45 = vld [vmem:[#allocation5 + $0xe0] sm:$0xff]  ;;  %v1080_v47 = vpack.c.bf16 %v258_v40, %v257_v39 }
  0x89   :  { %1076 = vmatprep.subr.bf16.mxu1 %v1446_v0  ;;  %v172_v46 = vld [vmem:[#allocation5 + $0xe8] sm:$0xff]  ;;  %v259_v48 = vld [vmem:[#allocation7 + $0x30] sm:$0xff]  ;;  %v260_v49 = vld [vmem:[#allocation7 + $0x38] sm:$0xff]  ;;  %v1063_v50 = vpack.c.bf16 %v154_v44, %v153_v43 }
  0x8a   :  { %1052 = vmatpush3.bf16.msra.mxu0 %v1051_v20  ;;  %v1065_v51 = vpack.c.bf16 %v172_v46, %v171_v45  ;;  %v155_v52 = vld [vmem:[#allocation5 + $0x60] sm:$0xff]  ;;  %v156_v53 = vld [vmem:[#allocation5 + $0x68] sm:$0xff]  ;;  %v173_v54 = vld [vmem:[#allocation5 + $0xf0] sm:$0xff]  ;;  %v1083_v56 = vpack.c.bf16 %v260_v49, %v259_v48 }
  0x8b   :  { %1054 = vmatprep.subr.bf16.mxu0 %v1053_v21  ;;  %v174_v55 = vld [vmem:[#allocation5 + $0xf8] sm:$0xff]  ;;  %v261_v57 = vld [vmem:[#allocation7 + $0x40] sm:$0xff]  ;;  %v262_v58 = vld [vmem:[#allocation7 + $0x48] sm:$0xff]  ;;  %v1067_v59 = vpack.c.bf16 %v156_v53, %v155_v52 }
  0x8c   :  { %1078 = vmatpush3.bf16.msra.mxu1 %v1077_v38  ;;  %v1069_v60 = vpack.c.bf16 %v174_v55, %v173_v54  ;;  %v157_v61 = vld [vmem:[#allocation5 + $0x70] sm:$0xff]  ;;  %v158_v62 = vld [vmem:[#allocation5 + $0x78] sm:$0xff]  ;;  %v1086_v63 = vpack.c.bf16 %v262_v58, %v261_v57  ;;  %v265_v6 = vld [vmem:[#allocation7 + $0x60] sm:$0xff] }
  0x8d   :  { %1079 = vmatprep.subr.bf16.mxu1 %v1446_v0  ;;  %v263_v1 = vld [vmem:[#allocation7 + $0x50] sm:$0xff]  ;;  %v264_v2 = vld [vmem:[#allocation7 + $0x58] sm:$0xff]  ;;  %v1071_v3 = vpack.c.bf16 %v158_v62, %v157_v61  ;;  %v266_v7 = vld [vmem:[#allocation7 + $0x68] sm:$0xff] }
  0x8e   :  { %1056 = vmatpush3.bf16.msra.mxu0 %v1055_v29  ;;  %v1089_v4 = vpack.c.bf16 %v264_v2, %v263_v1  ;;  %v141_v5 = vld [vmem:[#allocation2] sm:$0xff]  ;;  %v1092_v8 = vpack.c.bf16 %v266_v7, %v265_v6  ;;  %v268_v10 = vld [vmem:[#allocation7 + $0x78] sm:$0xff]  ;;  %v347_v13 = vld [vmem:[#allocation8] sm:$0xff] }
  0x8f   :  { %1058 = vmatprep.subr.bf16.mxu0 %v1057_v33  ;;  %v267_v9 = vld [vmem:[#allocation7 + $0x70] sm:$0xff]  ;;  %v348_v14 = vld [vmem:[#allocation8 + $0x8] sm:$0xff]  ;;  %v350_v17 = vld [vmem:[#allocation8 + $0x18] sm:$0xff] }
  0x90   :  { %1081 = vmatpush3.bf16.msra.mxu1 %v1080_v47  ;;  %v1095_v11 = vpack.c.bf16 %v268_v10, %v267_v9  ;;  %v349_v15 = vld [vmem:[#allocation8 + $0x10] sm:$0xff]  ;;  %v1098_v16 = vpack.c.bf16 %v348_v14, %v347_v13  ;;  %v351_v19 = vld [vmem:[#allocation8 + $0x20] sm:$0xff]  ;;  %v352_v20 = vld [vmem:[#allocation8 + $0x28] sm:$0xff] }
  0x91   :  { %1082 = vmatprep.subr.bf16.mxu1 %v1446_v0  ;;  %v1101_v18 = vpack.c.bf16 %v350_v17, %v349_v15  ;;  %v1104_v21 = vpack.c.bf16 %v352_v20, %v351_v19  ;;  %v353_v22 = vld [vmem:[#allocation8 + $0x30] sm:$0xff]  ;;  %v354_v23 = vld [vmem:[#allocation8 + $0x38] sm:$0xff]  ;;  %v355_v25 = vld [vmem:[#allocation8 + $0x40] sm:$0xff] }
  0x92   :  { %1060 = vmatpush3.bf16.msra.mxu0 %v1059_v41  ;;  %v1107_v24 = vpack.c.bf16 %v354_v23, %v353_v22  ;;  %v356_v26 = vld [vmem:[#allocation8 + $0x48] sm:$0xff]  ;;  %v357_v28 = vld [vmem:[#allocation8 + $0x50] sm:$0xff]  ;;  %v358_v29 = vld [vmem:[#allocation8 + $0x58] sm:$0xff] }
  0x93   :  { %1062 = vmatprep.subr.bf16.mxu0 %v1061_v42  ;;  %v1110_v27 = vpack.c.bf16 %v356_v26, %v355_v25  ;;  %v1113_v30 = vpack.c.bf16 %v358_v29, %v357_v28  ;;  %v359_v31 = vld [vmem:[#allocation8 + $0x60] sm:$0xff]  ;;  %v360_v32 = vld [vmem:[#allocation8 + $0x68] sm:$0xff]  ;;  %v791_v35 = vld [vmem:[%s1710_s2] ss:$0 sm:$0xff] }
  0x94   :  { %1084 = vmatpush3.bf16.msra.mxu1 %v1083_v56  ;;  %v1116_v33 = vpack.c.bf16 %v360_v32, %v359_v31  ;;  %v361_v40 = vld [vmem:[#allocation8 + $0x70] sm:$0xff]  ;;  %v362_v41 = vld [vmem:[#allocation8 + $0x78] sm:$0xff]  ;;  %v442_v43 = vld [vmem:[#allocation10] sm:$0xff] }
  0x95   :  { %1085 = vmatprep.subr.bf16.mxu1 %v1446_v0  ;;  %v1119_v42 = vpack.c.bf16 %v362_v41, %v361_v40  ;;  %v443_v44 = vld [vmem:[#allocation10 + $0x8] sm:$0xff]  ;;  %v444_v45 = vld [vmem:[#allocation10 + $0x10] sm:$0xff]  ;;  %v445_v47 = vld [vmem:[#allocation10 + $0x18] sm:$0xff] }
  0x96   :  { %1064 = vmatpush3.bf16.msra.mxu0 %v1063_v50  ;;  %v1122_v46 = vpack.c.bf16 %v443_v44, %v442_v43  ;;  %v1125_v48 = vpack.c.bf16 %v445_v47, %v444_v45  ;;  %v446_v49 = vld [vmem:[#allocation10 + $0x20] sm:$0xff]  ;;  %v447_v50 = vld [vmem:[#allocation10 + $0x28] sm:$0xff]  ;;  %v448_v52 = vld [vmem:[#allocation10 + $0x30] sm:$0xff] }
  0x97   :  { %1066 = vmatprep.subr.bf16.mxu0 %v1065_v51  ;;  %v1128_v51 = vpack.c.bf16 %v447_v50, %v446_v49  ;;  %v449_v53 = vld [vmem:[#allocation10 + $0x38] sm:$0xff]  ;;  %v450_v55 = vld [vmem:[#allocation10 + $0x40] sm:$0xff]  ;;  %v451_v56 = vld [vmem:[#allocation10 + $0x48] sm:$0xff] }
  0x98   :  { %1087 = vmatpush3.bf16.msra.mxu1 %v1086_v63  ;;  %v1131_v54 = vpack.c.bf16 %v449_v53, %v448_v52  ;;  %v1134_v57 = vpack.c.bf16 %v451_v56, %v450_v55  ;;  %v452_v58 = vld [vmem:[#allocation10 + $0x50] sm:$0xff]  ;;  %v454_v61 = vld [vmem:[#allocation10 + $0x60] sm:$0xff]  ;;  %v455_v62 = vld [vmem:[#allocation10 + $0x68] sm:$0xff] }
  0x99   :  { %1088 = vmatprep.subr.bf16.mxu1 %v1446_v0  ;;  %v1140_v63 = vpack.c.bf16 %v455_v62, %v454_v61  ;;  %v792_v1 = vld [vmem:[%s1712_s4] ss:$0 sm:$0xff]  ;;  %v457_v7 = vld [vmem:[#allocation10 + $0x78] sm:$0xff]  ;;  %v536_v9 = vld [vmem:[#allocation11] sm:$0xff] }
  0x9a   :  { %1068 = vmatpush3.bf16.msra.mxu0 %v1067_v59  ;;  %v453_v59 = vld [vmem:[#allocation10 + $0x58] sm:$0xff]  ;;  %v456_v6 = vld [vmem:[#allocation10 + $0x70] sm:$0xff]  ;;  %v537_v10 = vld [vmem:[#allocation11 + $0x8] sm:$0xff] }
  0x9b   :  { %1070 = vmatprep.subr.bf16.mxu0 %v1069_v60  ;;  %v1137_v60 = vpack.c.bf16 %v453_v59, %v452_v58  ;;  %v1146_v13 = vpack.c.bf16 %v537_v10, %v536_v9  ;;  %v539_v14 = vld [vmem:[#allocation11 + $0x18] sm:$0xff]  ;;  %v541_v17 = vld [vmem:[#allocation11 + $0x28] sm:$0xff]  ;;  %v542_v19 = vld [vmem:[#allocation11 + $0x30] sm:$0xff] }
  0x9c   :  { %1090 = vmatpush3.bf16.msra.mxu1 %v1089_v4  ;;  %v543_v20 = vld [vmem:[#allocation11 + $0x38] sm:$0xff]  ;;  %v544_v22 = vld [vmem:[#allocation11 + $0x40] sm:$0xff]  ;;  %v545_v23 = vld [vmem:[#allocation11 + $0x48] sm:$0xff] }
  0x9d   :  { %1091 = vmatprep.subr.bf16.mxu1 %v1446_v0  ;;  %v546_v25 = vld [vmem:[#allocation11 + $0x50] sm:$0xff]  ;;  %v547_v26 = vld [vmem:[#allocation11 + $0x58] sm:$0xff]  ;;  %v548_v28 = vld [vmem:[#allocation11 + $0x60] sm:$0xff] }
  0x9e   :  { %1072 = vmatpush3.bf16.msra.mxu0 %v1071_v3  ;;  %v549_v29 = vld [vmem:[#allocation11 + $0x68] sm:$0xff]  ;;  %v793_v31 = vld [vmem:[%s1714_s6] ss:$0 sm:$0xff]  ;;  %v630_v40 = vld [vmem:[#allocation13] sm:$0xff] }
  0x9f   :  { %1097 = vmatprep.subr.bf16.mxu0 %v1446_v0  ;;  %v632_v41 = vld [vmem:[#allocation13 + $0x10] sm:$0xff]  ;;  %v637_v43 = vld [vmem:[#allocation13 + $0x38] sm:$0xff]  ;;  %v643_v53 = vld [vmem:[#allocation13 + $0x68] sm:$0xff] }
  0xa0   :  { %1093 = vmatpush3.bf16.msra.mxu1 %v1092_v8  ;;  %v1143_v8 = vpack.c.bf16 %v457_v7, %v456_v6  ;;  %v1171_v44 = vpack.c.bf16 %v632_v41, %v630_v40  ;;  %v636_v47 = vld [vmem:[#allocation13 + $0x30] sm:$0xff]  ;;  %v641_v49 = vld [vmem:[#allocation13 + $0x58] sm:$0xff]  ;;  %v647_v59 = vld [vmem:[#allocation13 + $0x88] sm:$0xff] }
  0xa1   :  { %247 = vmatmul.mubr.f32.vlgmr.msra.gmra.mrb[0].mxu0 %v141_v5  ;;  %1094 = vmatprep.subr.bf16.mxu1 %v1446_v0  ;;  %v640_v52 = vld [vmem:[#allocation13 + $0x50] sm:$0xff]  ;;  %v650_v6 = vld [vmem:[#allocation13 + $0xa0] sm:$0xff]  ;;  %v657_v9 = vld [vmem:[#allocation13 + $0xd8] sm:$0xff] }
  0xa2   :  { %968 = vmatprep.mubr.msk.f32.mxu0 %vm1447_vm0, %v1448_v12  ;;  %1099 = vmatpush3.bf16.msra.mxu0 %v1098_v16  ;;  %v540_v16 = vld [vmem:[#allocation11 + $0x20] sm:$0xff]  ;;  %v644_v58 = vld [vmem:[#allocation13 + $0x70] sm:$0xff] }
  0xa3   :  { %1100 = vmatprep.subr.bf16.mxu0 %v1446_v0  ;;  %v652_v7 = vld [vmem:[#allocation13 + $0xb0] sm:$0xff] }
  0xa4   :  { %1096 = vmatpush3.bf16.msra.mxu1 %v1095_v11  ;;  %v538_v11 = vld [vmem:[#allocation11 + $0x10] sm:$0xff]  ;;  %v1191_v10 = vpack.c.bf16 %v652_v7, %v650_v6 }
  0xa5   :  { %1121 = vmatprep.subr.bf16.mxu1 %v1446_v0  ;;  %v1149_v15 = vpack.c.bf16 %v539_v14, %v538_v11  ;;  %v656_v14 = vld [vmem:[#allocation13 + $0xd0] sm:$0xff] }
  0xa6   :  { %1102 = vmatpush3.bf16.msra.mxu0 %v1101_v18  ;;  %v1152_v18 = vpack.c.bf16 %v541_v17, %v540_v16  ;;  %v794_v16 = vld [vmem:[%s1716_s8] ss:$0 sm:$0xff]  ;;  %s1449_s8 = smov [#allocation15]  }
  0xa7   :  { %1103 = vmatprep.subr.bf16.mxu0 %v1446_v0  ;;  %s775_s21 = sshll.u32 %s1449_s8, 4  ;;  %s776_s21 = int_to_ptr.vmem [resolvable:$true] %s775_s21 }
  0xa8   :  { %s1379_s3 = scalar_lea.vmem %s776_s21, 128  ;;  %p1384_p1 = scmp.lt.s32.totalorder %s776_s21, %s776_s21 }
  0xa9   :  { %p1380_p0 = scmp.ne.s32.totalorder %s776_s21, %s1379_s3  ;;  %p1385_p2 = scmp.lt.s32.totalorder %s1379_s3, %s1379_s3 }
  0xaa   :  { %1105 = vmatpush3.bf16.msra.mxu0 %v1104_v21  ;;  %v1155_v21 = vpack.c.bf16 %v543_v20, %v542_v19 }
  0xab   :  { %1106 = vmatprep.subr.bf16.mxu0 %v1446_v0  ;;  %p1386_p3 = por %p1385_p2, %p1384_p1 }
  0xad   :  { %p1387_p4 = pnand %p1386_p3, %p1380_p0 }
  0xae   :  { %1108 = vmatpush3.bf16.msra.mxu0 %v1107_v24  ;;  %v1158_v24 = vpack.c.bf16 %v545_v23, %v544_v22  ;;  %v661_v22 = vld [vmem:[#allocation13 + $0xf8] sm:$0xff] }
  0xaf   :  { %1109 = vmatprep.subr.bf16.mxu0 %v1446_v0 }
  0xb2   :  { %1111 = vmatpush3.bf16.msra.mxu0 %v1110_v27  ;;  %v1161_v27 = vpack.c.bf16 %v547_v26, %v546_v25  ;;  %v660_v25 = vld [vmem:[#allocation13 + $0xf0] sm:$0xff] }
  0xb3   :  { %1112 = vmatprep.subr.bf16.mxu0 %v1446_v0 }
  0xb6   :  { %1114 = vmatpush3.bf16.msra.mxu0 %v1113_v30  ;;  %v1164_v30 = vpack.c.bf16 %v549_v29, %v548_v28 }
  0xb7   :  { %1115 = vmatprep.subr.bf16.mxu0 %v1446_v0 }
  0xba   :  { %1117 = vmatpush3.bf16.msra.mxu0 %v1116_v33 }
  0xbb   :  { %1118 = vmatprep.subr.bf16.mxu0 %v1446_v0 }
  0xbe   :  { %1120 = vmatpush3.bf16.msra.mxu0 %v1119_v42  ;;  %v635_v42 = vld [vmem:[#allocation13 + $0x28] sm:$0xff] }
  0xbf   :  { %1145 = vmatprep.subr.bf16.mxu0 %v1446_v0  ;;  %v1173_v45 = vpack.c.bf16 %v637_v43, %v635_v42 }
 0x174   :  { %v830_v34 = vpop.f32.mrb[0].mxu0 }
 0x175   :  { %v831_v36 = vpop.f32.mrb[1].mxu0 }
 0x176   :  { %v832_v37 = vadd.f32 %v831_v36, %v830_v34  ;;  %v551_v36 = vld [vmem:[#allocation11 + $0x78] sm:$0xff] }
 0x178   :  { %v249_v38 = vadd.f32 %v832_v37, %v791_v35  ;;  %v550_v35 = vld [vmem:[#allocation11 + $0x70] sm:$0xff] }
 0x179   :  { %v1167_v37 = vpack.c.bf16 %v551_v36, %v550_v35 }
 0x17a   :  { %v252_v39 = vmax.f32 %v249_v38, 0.0  ;;  %v631_v38 = vld [vmem:[#allocation13 + $0x8] sm:$0xff] }
 0x17c   :  { %934 = vmatmul.mubr.f32.vlgmr.msra.gmra.mrb[0].mxu1 %v252_v39  ;;  %v633_v39 = vld [vmem:[#allocation13 + $0x18] sm:$0xff] }
 0x17d   :  { %1003 = vmatprep.mubr.msk.f32.mxu1 %vm1447_vm0, %v1448_v12  ;;  %1123 = vmatpush3.bf16.msra.mxu1 %v1122_v46  ;;  %v634_v46 = vld [vmem:[#allocation13 + $0x20] sm:$0xff] }
 0x17e   :  { %1124 = vmatprep.subr.bf16.mxu1 %v1446_v0 }
 0x181   :  { %1126 = vmatpush3.bf16.msra.mxu1 %v1125_v48  ;;  %v639_v48 = vld [vmem:[#allocation13 + $0x48] sm:$0xff] }
 0x182   :  { %1127 = vmatprep.subr.bf16.mxu1 %v1446_v0  ;;  %v1177_v50 = vpack.c.bf16 %v641_v49, %v639_v48 }
 0x185   :  { %1129 = vmatpush3.bf16.msra.mxu1 %v1128_v51  ;;  %v638_v51 = vld [vmem:[#allocation13 + $0x40] sm:$0xff] }
 0x186   :  { %1130 = vmatprep.subr.bf16.mxu1 %v1446_v0  ;;  %v1179_v55 = vpack.c.bf16 %v640_v52, %v638_v51 }
 0x189   :  { %1132 = vmatpush3.bf16.msra.mxu1 %v1131_v54  ;;  %v645_v54 = vld [vmem:[#allocation13 + $0x78] sm:$0xff] }
 0x18a   :  { %1133 = vmatprep.subr.bf16.mxu1 %v1446_v0  ;;  %v1181_v56 = vpack.c.bf16 %v645_v54, %v643_v53 }
 0x18d   :  { %1135 = vmatpush3.bf16.msra.mxu1 %v1134_v57  ;;  %v642_v57 = vld [vmem:[#allocation13 + $0x60] sm:$0xff] }
 0x18e   :  { %1136 = vmatprep.subr.bf16.mxu1 %v1446_v0  ;;  %v1183_v61 = vpack.c.bf16 %v644_v58, %v642_v57 }
 0x191   :  { %1138 = vmatpush3.bf16.msra.mxu1 %v1137_v60  ;;  %v649_v60 = vld [vmem:[#allocation13 + $0x98] sm:$0xff] }
 0x192   :  { %1139 = vmatprep.subr.bf16.mxu1 %v1446_v0  ;;  %v1185_v62 = vpack.c.bf16 %v649_v60, %v647_v59 }
 0x195   :  { %1141 = vmatpush3.bf16.msra.mxu1 %v1140_v63  ;;  %v646_v63 = vld [vmem:[#allocation13 + $0x80] sm:$0xff] }
 0x196   :  { %1142 = vmatprep.subr.bf16.mxu1 %v1446_v0 }
 0x199   :  { %1144 = vmatpush3.bf16.msra.mxu1 %v1143_v8  ;;  %v655_v8 = vld [vmem:[#allocation13 + $0xc8] sm:$0xff] }
 0x19a   :  { %v1193_v11 = vpack.c.bf16 %v657_v9, %v655_v8 }
 0x24f   :  { %v342_v2 = vpop.f32.mrb[0].mxu1 }
 0x250   :  { %v343_v3 = vadd.f32 %v792_v1, %v342_v2  ;;  %v935_v4 = vpop.f32.mrb[1].mxu1  ;;  %v648_v1 = vld [vmem:[#allocation13 + $0x90] sm:$0xff]  ;;  %v651_v2 = vld [vmem:[#allocation13 + $0xa8] sm:$0xff] }
 0x251   :  { %v1187_v4 = vpack.c.bf16 %v648_v1, %v646_v63 }
 0x252   :  { %v346_v5 = vmax.f32 %v343_v3, 0.0  ;;  %v653_v3 = vld [vmem:[#allocation13 + $0xb8] sm:$0xff] }
 0x254   :  { %969 = vmatmul.mubr.f32.vlgmr.msra.gmra.mrb[2].mxu0 %v346_v5  ;;  %v1189_v5 = vpack.c.bf16 %v653_v3, %v651_v2 }
 0x255   :  { %1038 = vmatprep.mubr.msk.f32.mxu0 %vm1447_vm0, %v1448_v12  ;;  %1147 = vmatpush3.bf16.msra.mxu0 %v1146_v13  ;;  %v654_v13 = vld [vmem:[#allocation13 + $0xc0] sm:$0xff] }
 0x256   :  { %1148 = vmatprep.subr.bf16.mxu0 %v1446_v0 }
 0x259   :  { %1150 = vmatpush3.bf16.msra.mxu0 %v1149_v15  ;;  %v1195_v15 = vpack.c.bf16 %v656_v14, %v654_v13 }
 0x25a   :  { %1151 = vmatprep.subr.bf16.mxu0 %v1446_v0 }
 0x25d   :  { %1153 = vmatpush3.bf16.msra.mxu0 %v1152_v18 }
 0x25e   :  { %1154 = vmatprep.subr.bf16.mxu0 %v1446_v0 }
 0x261   :  { %1156 = vmatpush3.bf16.msra.mxu0 %v1155_v21  ;;  %v659_v21 = vld [vmem:[#allocation13 + $0xe8] sm:$0xff] }
 0x262   :  { %1157 = vmatprep.subr.bf16.mxu0 %v1446_v0  ;;  %v1197_v23 = vpack.c.bf16 %v661_v22, %v659_v21 }
 0x265   :  { %1159 = vmatpush3.bf16.msra.mxu0 %v1158_v24  ;;  %v658_v24 = vld [vmem:[#allocation13 + $0xe0] sm:$0xff] }
 0x266   :  { %1160 = vmatprep.subr.bf16.mxu0 %v1446_v0  ;;  %v1199_v26 = vpack.c.bf16 %v660_v25, %v658_v24 }
 0x269   :  { %1162 = vmatpush3.bf16.msra.mxu0 %v1161_v27  ;;  %v795_v27 = vld [vmem:[%s1718_s10] ss:$0 sm:$0xff] }
 0x26a   :  { %1163 = vmatprep.subr.bf16.mxu0 %v1446_v0 }
 0x26d   :  { %1165 = vmatpush3.bf16.msra.mxu0 %v1164_v30 }
 0x26e   :  { %1166 = vmatprep.subr.bf16.mxu0 %v1446_v0  ;;  %v1169_v0 = vpack.c.bf16 %v633_v39, %v631_v38 }
 0x270   :  { %1170 = vmatprep.subr.bf16.mxu1 %v1169_v0 }
 0x271   :  { %1168 = vmatpush3.bf16.msra.mxu0 %v1167_v37 }
 0x327   :  { %v436_v32 = vpop.f32.mrb[2].mxu0 }
 0x328   :  { %v437_v33 = vadd.f32 %v793_v31, %v436_v32  ;;  %v970_v34 = vpop.f32.mrb[3].mxu0 }
 0x32a   :  { %1004 = vmatmul.mubr.f32.vlgmr.msra.gmra.mrb[2].mxu1 %v437_v33  ;;  %441 = vst.msk [vmem:[#allocation15] sm:$0xff] %vm440_vm1, %v437_v33 }
 0x32b   :  { %738 = vmatprep.mubr.f32.mxu1 %v1448_v12  ;;  %1172 = vmatpush1.bf16.msra.mxu1 %v1171_v44  ;;  %v1175_v12 = vpack.c.bf16 %v636_v47, %v634_v46 }
 0x32c   :  { %1174 = vmatprep.subr.bf16.mxu1 %v1173_v45 }
 0x32f   :  { %1176 = vmatpush1.bf16.msra.mxu1 %v1175_v12 }
 0x330   :  { %1178 = vmatprep.subr.bf16.mxu1 %v1177_v50 }
 0x333   :  { %1180 = vmatpush1.bf16.msra.mxu1 %v1179_v55 }
 0x334   :  { %1182 = vmatprep.subr.bf16.mxu1 %v1181_v56 }
 0x337   :  { %1184 = vmatpush1.bf16.msra.mxu1 %v1183_v61 }
 0x338   :  { %1186 = vmatprep.subr.bf16.mxu1 %v1185_v62 }
 0x33b   :  { %1188 = vmatpush1.bf16.msra.mxu1 %v1187_v4 }
 0x33c   :  { %1190 = vmatprep.subr.bf16.mxu1 %v1189_v5 }
 0x33f   :  { %1192 = vmatpush1.bf16.msra.mxu1 %v1191_v10 }
 0x340   :  { %1194 = vmatprep.subr.bf16.mxu1 %v1193_v11 }
 0x343   :  { %1196 = vmatpush1.bf16.msra.mxu1 %v1195_v15 }
 0x344   :  { %1198 = vmatprep.subr.bf16.mxu1 %v1197_v23 }
 0x347   :  { %1200 = vmatpush1.bf16.msra.mxu1 %v1199_v26 }
 0x3fd   :  { %v531_v17 = vpop.f32.mrb[2].mxu1 }
 0x3fe   :  { %v532_v18 = vadd.f32 %v794_v16, %v531_v17  ;;  %v1005_v19 = vpop.f32.mrb[3].mxu1 }
 0x400   :  { %v535_v20 = vmax.f32 %v532_v18, 0.0 }
 0x402   :  { %1039 = vmatmul.mubr.f32.vlgmr.msra.gmra.mrb[4].mxu0 %v535_v20 }
 0x4d5   :  { %v625_v28 = vpop.f32.mrb[4].mxu0 }
 0x4d6   :  { %v626_v29 = vadd.f32 %v795_v27, %v625_v28  ;;  %v1040_v30 = vpop.f32.mrb[5].mxu0 }
 0x4d8   :  { %v629_v31 = vmax.f32 %v626_v29, 0.0 }
 0x4da   :  { %739 = vmatmul.mubr.f32.vlgmr.msra.gmra.mrb[4].mxu1 %v629_v31 }
 0x4db   :  { %1390 = shalt.err (!%p1387_p4)
}
 0x4dc   :  { %s1391_s25 = scalar_lea.hbm %s1722_s14, 128 }
 0x4dd   :  { %p1392_p5 = scmp.ne.s32.totalorder %s1722_s14, %s1391_s25  ;;  %p1395_p6 = scmp.lt.u32.totalorder %s1391_s25, %s1722_s14 }
 0x4df   :  { %p1397_p7 = pnand %p1395_p6, %p1392_p5 }
 0x4e1   :  { %1400 = shalt.err (!%p1397_p7)
}
 0x4e2   :  { %778 = dma.vmem_to_hbm [thread:$0]  %s776_s21, 128, %s1722_s14, [#allocation16]   ;;  %v664_v32 = vlaneseq  ;;  %v662_v35 = vld [vmem:[%s1720_s12] sm:$0x3] }
 0x4e3   :  { %s1450_s14 = smov [#allocation14]  }
 0x4e4   :  { %v665_v33 = vshrl.u32 %v664_v32, 7  ;;  %s765_s7 = sshll.u32 %s1450_s14, 4  ;;  %s766_s7 = int_to_ptr.vmem [resolvable:$true] %s765_s7 }
 0x4e5   :  { %s1401_s12 = scalar_lea.vmem %s766_s7, 256  ;;  %p1406_p9 = scmp.lt.s32.totalorder %s766_s7, %s766_s7 }
 0x4e6   :  { %v666_v34 = vsub.s32 0, %v665_v33  ;;  %v670_v36 = vsub.s32 1, %v665_v33  ;;  %p1402_p8 = scmp.ne.s32.totalorder %s766_s7, %s1401_s12  ;;  %p1407_p10 = scmp.lt.s32.totalorder %s1401_s12, %s1401_s12 }
 0x4e8   :  { %v667_v37 = vrot.slane %v662_v35, %v666_v34  ;;  %v671_v38 = vrot.slane %v662_v35, %v670_v36  ;;  %p1408_p11 = por %p1407_p10, %p1406_p9 }
 0x4ea   :  { %p1409_p12 = pnand %p1408_p11, %p1402_p8 }
 0x5ad   :  { %v740_v39 = vpop.f32.mrb[4].mxu1 }
 0x5ae   :  { %v741_v40 = vadd.f32 %v740_v39, %v667_v37  ;;  %v742_v0 = vpop.f32.mrb[5].mxu1 }
 0x5af   :  { %v743_v41 = vadd.f32 %v742_v0, %v671_v38 }
 0x5b0   :  { %v796_v42 = vmul.f32 -1.442695, %v741_v40 }
 0x5b1   :  { %v797_v43 = vmul.f32 -1.442695, %v743_v41 }
 0x5b2   :  { %1217 = vpow2.f32 %v796_v42 }
 0x5b3   :  { %1219 = vpow2.f32 %v797_v43 }
 0x5bc   :  { %v1218_v44 = vpop.eup %1217 }
 0x5bd   :  { %v1220_v45 = vpop.eup %1219  ;;  %v751_v46 = vadd.f32 1.0, %v1218_v44 }
 0x5be   :  { %v752_v47 = vadd.f32 1.0, %v1220_v45 }
 0x5bf   :  { %1221 = vrcp.f32 %v751_v46 }
 0x5c0   :  { %1223 = vrcp.f32 %v752_v47 }
 0x5c9   :  { %v1222_v48 = vpop.eup %1221 }
 0x5ca   :  { %v1224_v49 = vpop.eup %1223  ;;  %757 = vst [vmem:[#allocation14] sm:$0xff] %v1222_v48 }
 0x5cb   :  { %758 = vst [vmem:[#allocation14 + $0x8] sm:$0xff] %v1224_v49 }
 0x5cc   :  { %1412 = shalt.err (!%p1409_p12)
}
 0x5cd   :  { %s1413_s16 = scalar_lea.hbm %s1721_s13, 256 }
 0x5ce   :  { %p1414_p13 = scmp.ne.s32.totalorder %s1721_s13, %s1413_s16  ;;  %p1417_p0 = scmp.lt.u32.totalorder %s1413_s16, %s1721_s13 }
 0x5d0   :  { %p1419_p1 = pnand %p1417_p0, %p1414_p13 }
 0x5d2   :  { %1422 = shalt.err (!%p1419_p1)
}
 0x5d3   :  { %768 = dma.vmem_to_hbm [thread:$0]  %s766_s7, 256, %s1721_s13, [#allocation4]  }
 0x5d4   :  { %1431 = dma.done.wait [#allocation4], 256  }
 0x5d5   :  { %1432 = vsyncadd [#allocation4], 4294967040 }
 0x5d6   :  { %1433 = dma.done.wait [#allocation16], 128  }
 0x5d7   :  { %1434 = vsyncadd [#allocation16], 4294967168 }
 0x5d8   :  { %785 = vsyncpa [#allocation3], 1 }
 0x5d9   :  { %786 = vsyncpa [#allocation6], 1 }
 0x5da   :  { %787 = vsyncpa [#allocation9], 1 }
 0x5db   :  { %788 = vsyncpa [#allocation12], 1 }
 0x5dc   :  { %789 = vsyncpa [#allocation4], 1 }
 0x5dd   :  { %790 = vsyncpa [#allocation16], 1 }

// kernel: tpu_custom_call.1
= control target key start
LH: loop header
LB: loop body
LE: loop exit
PB: predicated region body
PF: predicated region fallthrough
CT: control target
= control target key end

     0   :  { %20 = vsyncpa [#allocation3], 0  ;;  %s1708_s0 = inlined_call_operand.hbm [shape: f32[8,256], index: 0, kind: input, shape index: {}]   ;;  %s1709_s1 = inlined_call_operand.hbm [shape: f32[256,128], index: 1, kind: input, shape index: {}]   ;;  %s1710_s2 = inlined_call_operand.vmem [shape: f32[1,128], index: 2, kind: input, shape index: {}]   ;;  %s1711_s3 = inlined_call_operand.hbm [shape: f32[128,128], index: 3, kind: input, shape index: {}]   ;;  %s1712_s4 = inlined_call_operand.vmem [shape: f32[1,128], index: 4, kind: input, shape index: {}]   ;;  %s1713_s5 = inlined_call_operand.hbm [shape: f32[128,128], index: 5, kind: input, shape index: {}]   ;;  %s1714_s6 = inlined_call_operand.vmem [shape: f32[1,128], index: 6, kind: input, shape index: {}]   ;;  %s1715_s7 = inlined_call_operand.hbm [shape: f32[128,128], index: 7, kind: input, shape index: {}]   ;;  %s1716_s8 = inlined_call_operand.vmem [shape: f32[1,128], index: 8, kind: input, shape index: {}]   ;;  %s1717_s9 = inlined_call_operand.hbm [shape: f32[128,128], index: 9, kind: input, shape index: {}]   ;;  %s1718_s10 = inlined_call_operand.vmem [shape: f32[1,128], index: 10, kind: input, shape index: {}]   ;;  %s1719_s11 = inlined_call_operand.hbm [shape: f32[128,256], index: 11, kind: input, shape index: {}]   ;;  %s1720_s12 = inlined_call_operand.vmem [shape: f32[1,256], index: 12, kind: input, shape index: {}]   ;;  %s1721_s13 = inlined_call_operand.hbm [shape: f32[8,256], index: 13, kind: output, shape index: {0}]   ;;  %s1722_s14 = inlined_call_operand.hbm [shape: f32[8,64], index: 14, kind: output, shape index: {1}]  }
   0x1   :  { %21 = vsyncpa [#allocation6], 0 }
   0x2   :  { %22 = vsyncpa [#allocation9], 0 }
   0x3   :  { %23 = vsyncpa [#allocation12], 0 }
   0x4   :  { %24 = vsyncpa [#allocation4], 0 }
   0x5   :  { %25 = vsyncpa [#allocation16], 0  ;;  %s1435_s29 = smov [#allocation5]   ;;  %s1225_s17 = scalar_lea.hbm %s1709_s1, 4096 }
   0x6   :  { %s41_s30 = sshll.u32 %s1435_s29, 4  ;;  %p1226_p0 = scmp.ne.s32.totalorder %s1709_s1, %s1225_s17  ;;  %s42_s30 = int_to_ptr.vmem [resolvable:$true] %s41_s30 }
   0x7   :  { %p1229_p1 = scmp.lt.u32.totalorder %s1225_s17, %s1709_s1 }
   0x9   :  { %p1231_p2 = pnand %p1229_p1, %p1226_p0 }
   0xb   :  { %1234 = shalt.err (!%p1231_p2)
}
   0xc   :  { %s1235_s22 = scalar_lea.vmem %s42_s30, 4096  ;;  %p1240_p4 = scmp.lt.s32.totalorder %s42_s30, %s42_s30 }
   0xd   :  { %p1236_p3 = scmp.ne.s32.totalorder %s42_s30, %s1235_s22  ;;  %p1241_p5 = scmp.lt.s32.totalorder %s1235_s22, %s1235_s22 }
   0xf   :  { %p1242_p6 = por %p1241_p5, %p1240_p4 }
  0x11   :  { %p1243_p7 = pnand %p1242_p6, %p1236_p3 }
  0x13   :  { %1246 = shalt.err (!%p1243_p7)
}
  0x14   :  { %s1436_s23 = smov 128   ;;  %s1437_s24 = smov 8  }
  0x15   :  { %47 = dma.hbm_to_vmem [thread:$0]  %s1709_s1, 4096, %s42_s30, [#allocation6], %s1436_s23, %s1436_s23, %s1437_s24  }
  0x16   :  { %s1438_s27 = smov [#allocation8]   ;;  %s1439_s29 = smov [#allocation11]  }
  0x17   :  { %s69_s28 = sshll.u32 %s1438_s27, 4  ;;  %s97_s15 = sshll.u32 %s1439_s29, 4  ;;  %s70_s28 = int_to_ptr.vmem [resolvable:$true] %s69_s28  ;;  %s98_s15 = int_to_ptr.vmem [resolvable:$true] %s97_s15 }
  0x18   :  { %s1247_s18 = scalar_lea.hbm %s1713_s5, 2048 }
  0x19   :  { %p1248_p8 = scmp.ne.s32.totalorder %s1713_s5, %s1247_s18  ;;  %p1251_p9 = scmp.lt.u32.totalorder %s1247_s18, %s1713_s5 }
  0x1b   :  { %p1253_p10 = pnand %p1251_p9, %p1248_p8 }
  0x1d   :  { %1256 = shalt.err (!%p1253_p10)
}
  0x1e   :  { %s1257_s1 = scalar_lea.vmem %s70_s28, 2048  ;;  %p1262_p12 = scmp.lt.s32.totalorder %s70_s28, %s70_s28 }
  0x1f   :  { %p1258_p11 = scmp.ne.s32.totalorder %s70_s28, %s1257_s1  ;;  %p1263_p13 = scmp.lt.s32.totalorder %s1257_s1, %s1257_s1 }
  0x21   :  { %p1264_p0 = por %p1263_p13, %p1262_p12 }
  0x23   :  { %p1265_p1 = pnand %p1264_p0, %p1258_p11 }
  0x25   :  { %1268 = shalt.err (!%p1265_p1)
}
  0x26   :  { %75 = dma.hbm_to_vmem [thread:$0]  %s1713_s5, 2048, %s70_s28, [#allocation9], %s1436_s23, %s1436_s23, %s1437_s24  }
  0x27   :  { %s1269_s29 = scalar_lea.hbm %s1717_s9, 2048 }
  0x28   :  { %p1270_p2 = scmp.ne.s32.totalorder %s1717_s9, %s1269_s29  ;;  %p1273_p3 = scmp.lt.u32.totalorder %s1269_s29, %s1717_s9 }
  0x2a   :  { %p1275_p4 = pnand %p1273_p3, %p1270_p2 }
  0x2c   :  { %1278 = shalt.err (!%p1275_p4)
}
  0x2d   :  { %s1279_s20 = scalar_lea.vmem %s98_s15, 2048  ;;  %p1284_p6 = scmp.lt.s32.totalorder %s98_s15, %s98_s15 }
  0x2e   :  { %p1280_p5 = scmp.ne.s32.totalorder %s98_s15, %s1279_s20  ;;  %p1285_p7 = scmp.lt.s32.totalorder %s1279_s20, %s1279_s20 }
  0x30   :  { %p1286_p8 = por %p1285_p7, %p1284_p6 }
  0x32   :  { %p1287_p9 = pnand %p1286_p8, %p1280_p5 }
  0x34   :  { %1290 = shalt.err (!%p1287_p9)
}
  0x35   :  { %103 = dma.hbm_to_vmem [thread:$0]  %s1717_s9, 2048, %s98_s15, [#allocation12], %s1436_s23, %s1436_s23, %s1437_s24  }
  0x36   :  { %s1440_s21 = smov [#allocation2]   ;;  %s1441_s1 = smov [#allocation7]  }
  0x37   :  { %s32_s22 = sshll.u32 %s1440_s21, 4  ;;  %s55_s30 = sshll.u32 %s1441_s1, 4  ;;  %s33_s22 = int_to_ptr.vmem [resolvable:$true] %s32_s22  ;;  %s56_s30 = int_to_ptr.vmem [resolvable:$true] %s55_s30 }
  0x38   :  { %s1291_s27 = scalar_lea.hbm %s1708_s0, 256 }
  0x39   :  { %p1292_p10 = scmp.ne.s32.totalorder %s1708_s0, %s1291_s27  ;;  %p1295_p11 = scmp.lt.u32.totalorder %s1291_s27, %s1708_s0 }
  0x3b   :  { %p1297_p12 = pnand %p1295_p11, %p1292_p10 }
  0x3d   :  { %1300 = shalt.err (!%p1297_p12)
}
  0x3e   :  { %s1301_s9 = scalar_lea.vmem %s33_s22, 256  ;;  %p1306_p0 = scmp.lt.s32.totalorder %s33_s22, %s33_s22 }
  0x3f   :  { %p1302_p13 = scmp.ne.s32.totalorder %s33_s22, %s1301_s9  ;;  %p1307_p1 = scmp.lt.s32.totalorder %s1301_s9, %s1301_s9 }
  0x41   :  { %p1308_p2 = por %p1307_p1, %p1306_p0 }
  0x43   :  { %p1309_p3 = pnand %p1308_p2, %p1302_p13 }
  0x45   :  { %1312 = shalt.err (!%p1309_p3)
}
  0x46   :  { %35 = dma.hbm_to_vmem [thread:$0]  %s1708_s0, 256, %s33_s22, [#allocation3]  }
  0x47   :  { %s1313_s28 = scalar_lea.hbm %s1711_s3, 2048 }
  0x48   :  { %p1314_p4 = scmp.ne.s32.totalorder %s1711_s3, %s1313_s28  ;;  %p1317_p5 = scmp.lt.u32.totalorder %s1313_s28, %s1711_s3 }
  0x4a   :  { %p1319_p6 = pnand %p1317_p5, %p1314_p4 }
  0x4c   :  { %1322 = shalt.err (!%p1319_p6)
}
  0x4d   :  { %s1323_s27 = scalar_lea.vmem %s56_s30, 2048  ;;  %p1328_p8 = scmp.lt.s32.totalorder %s56_s30, %s56_s30 }
  0x4e   :  { %p1324_p7 = scmp.ne.s32.totalorder %s56_s30, %s1323_s27  ;;  %p1329_p9 = scmp.lt.s32.totalorder %s1323_s27, %s1323_s27 }
  0x50   :  { %p1330_p10 = por %p1329_p9, %p1328_p8 }
  0x52   :  { %p1331_p11 = pnand %p1330_p10, %p1324_p7 }
  0x54   :  { %1334 = shalt.err (!%p1331_p11)
}
  0x55   :  { %61 = dma.hbm_to_vmem [thread:$0]  %s1711_s3, 2048, %s56_s30, [#allocation6], %s1436_s23, %s1436_s23, %s1437_s24  }
  0x56   :  { %s1442_s29 = smov [#allocation10]   ;;  %s1443_s17 = smov [#allocation13]  }
  0x57   :  { %s83_s16 = sshll.u32 %s1442_s29, 4  ;;  %s111_s18 = sshll.u32 %s1443_s17, 4  ;;  %s84_s16 = int_to_ptr.vmem [resolvable:$true] %s83_s16  ;;  %s112_s18 = int_to_ptr.vmem [resolvable:$true] %s111_s18 }
  0x58   :  { %s1335_s19 = scalar_lea.hbm %s1715_s7, 2048 }
  0x59   :  { %p1336_p12 = scmp.ne.s32.totalorder %s1715_s7, %s1335_s19  ;;  %p1339_p13 = scmp.lt.u32.totalorder %s1335_s19, %s1715_s7 }
  0x5b   :  { %p1341_p0 = pnand %p1339_p13, %p1336_p12 }
  0x5d   :  { %1344 = shalt.err (!%p1341_p0)
}
  0x5e   :  { %s1345_s3 = scalar_lea.vmem %s84_s16, 2048  ;;  %p1350_p2 = scmp.lt.s32.totalorder %s84_s16, %s84_s16 }
  0x5f   :  { %p1346_p1 = scmp.ne.s32.totalorder %s84_s16, %s1345_s3  ;;  %p1351_p3 = scmp.lt.s32.totalorder %s1345_s3, %s1345_s3 }
  0x61   :  { %p1352_p4 = por %p1351_p3, %p1350_p2 }
  0x63   :  { %p1353_p5 = pnand %p1352_p4, %p1346_p1 }
  0x65   :  { %1356 = shalt.err (!%p1353_p5)
}
  0x66   :  { %89 = dma.hbm_to_vmem [thread:$0]  %s1715_s7, 2048, %s84_s16, [#allocation9], %s1436_s23, %s1436_s23, %s1437_s24  }
  0x67   :  { %s1357_s27 = scalar_lea.hbm %s1719_s11, 4096 }
  0x68   :  { %p1358_p6 = scmp.ne.s32.totalorder %s1719_s11, %s1357_s27  ;;  %p1361_p7 = scmp.lt.u32.totalorder %s1357_s27, %s1719_s11 }
  0x6a   :  { %p1363_p8 = pnand %p1361_p7, %p1358_p6 }
  0x6c   :  { %1366 = shalt.err (!%p1363_p8)
}
  0x6d   :  { %s1367_s9 = scalar_lea.vmem %s112_s18, 4096  ;;  %p1372_p10 = scmp.lt.s32.totalorder %s112_s18, %s112_s18 }
  0x6e   :  { %p1368_p9 = scmp.ne.s32.totalorder %s112_s18, %s1367_s9  ;;  %p1373_p11 = scmp.lt.s32.totalorder %s1367_s9, %s1367_s9 }
  0x70   :  { %p1374_p12 = por %p1373_p11, %p1372_p10 }
  0x72   :  { %p1375_p13 = pnand %p1374_p12, %p1368_p9 }
  0x74   :  { %1378 = shalt.err (!%p1375_p13)
}
  0x75   :  { %s1444_s7 = smov 256   ;;  %s1445_s23 = smov 16  }
  0x76   :  { %117 = dma.hbm_to_vmem [thread:$0]  %s1719_s11, 4096, %s112_s18, [#allocation12], %s1444_s7, %s1444_s7, %s1445_s23  }
  0x77   :  { %1423 = dma.done.wait [#allocation3], 256  }
  0x78   :  { %1424 = vsyncadd [#allocation3], 4294967040 }
  0x79   :  { %1425 = dma.done.wait [#allocation6], 6144  }
  0x7a   :  { %1426 = vsyncadd [#allocation6], 4294961152 }
  0x7b   :  { %1427 = dma.done.wait [#allocation9], 4096  }
  0x7c   :  { %1428 = vsyncadd [#allocation9], 4294963200 }
  0x7d   :  { %1429 = dma.done.wait [#allocation12], 6144  }
  0x7e   :  { %1430 = vsyncadd [#allocation12], 4294961152  ;;  %v1446_v0 = vmov 0.0|0.0   ;;  %v159_v1 = vld [vmem:[#allocation5 + $0x80] sm:$0xff]  ;;  %v160_v2 = vld [vmem:[#allocation5 + $0x88] sm:$0xff]  ;;  %vm1447_vm0 = vmmov 0  }
  0x7f   :  { %1073 = vmatprep.subr.bf16.mxu1 %v1446_v0  ;;  %v143_v3 = vld [vmem:[#allocation5] sm:$0xff]  ;;  %v1041_v4 = vpack.c.bf16 %v160_v2, %v159_v1  ;;  %v144_v5 = vld [vmem:[#allocation5 + $0x8] sm:$0xff]  ;;  %v161_v6 = vld [vmem:[#allocation5 + $0x90] sm:$0xff]  ;;  %vm440_vm1 = vcmask 523264  }
  0x80   :  { %v162_v7 = vld [vmem:[#allocation5 + $0x98] sm:$0xff]  ;;  %v1043_v8 = vpack.c.bf16 %v144_v5, %v143_v3  ;;  %v145_v10 = vld [vmem:[#allocation5 + $0x10] sm:$0xff]  ;;  %v163_v12 = vld [vmem:[#allocation5 + $0xa0] sm:$0xff] }
  0x81   :  { %v1045_v9 = vpack.c.bf16 %v162_v7, %v161_v6  ;;  %v146_v11 = vld [vmem:[#allocation5 + $0x18] sm:$0xff]  ;;  %1042 = vmatprep.subr.bf16.mxu0 %v1041_v4  ;;  %v164_v13 = vld [vmem:[#allocation5 + $0xa8] sm:$0xff]  ;;  %v147_v16 = vld [vmem:[#allocation5 + $0x20] sm:$0xff] }
  0x82   :  { %1044 = vmatpush3.bf16.msra.mxu0 %v1043_v8  ;;  %v1047_v14 = vpack.c.bf16 %v146_v11, %v145_v10  ;;  %v1049_v15 = vpack.c.bf16 %v164_v13, %v163_v12  ;;  %v148_v17 = vld [vmem:[#allocation5 + $0x28] sm:$0xff]  ;;  %v165_v18 = vld [vmem:[#allocation5 + $0xb0] sm:$0xff]  ;;  %v166_v19 = vld [vmem:[#allocation5 + $0xb8] sm:$0xff]  ;;  %v1448_v12 = vmov 0.0  }
  0x83   :  { %1046 = vmatprep.subr.bf16.mxu0 %v1045_v9  ;;  %v1051_v20 = vpack.c.bf16 %v148_v17, %v147_v16  ;;  %v1053_v21 = vpack.c.bf16 %v166_v19, %v165_v18  ;;  %v149_v22 = vld [vmem:[#allocation5 + $0x30] sm:$0xff]  ;;  %v150_v23 = vld [vmem:[#allocation5 + $0x38] sm:$0xff]  ;;  %v167_v24 = vld [vmem:[#allocation5 + $0xc0] sm:$0xff]  ;;  %933 = vmatprep.mubr.msk.f32.mxu1 %vm1447_vm0, %v1448_v12 }
  0x84   :  { %v168_v25 = vld [vmem:[#allocation5 + $0xc8] sm:$0xff]  ;;  %v142_v26 = vld [vmem:[#allocation2 + $0x8] sm:$0xff]  ;;  %v253_v27 = vld [vmem:[#allocation7] sm:$0xff]  ;;  %v1055_v29 = vpack.c.bf16 %v150_v23, %v149_v22 }
  0x85   :  { %246 = vmatprep.mubr.f32.mxu0 %v142_v26  ;;  %v254_v28 = vld [vmem:[#allocation7 + $0x8] sm:$0xff]  ;;  %v255_v31 = vld [vmem:[#allocation7 + $0x10] sm:$0xff]  ;;  %v256_v32 = vld [vmem:[#allocation7 + $0x18] sm:$0xff]  ;;  %v1057_v33 = vpack.c.bf16 %v168_v25, %v167_v24 }
  0x86   :  { %1048 = vmatpush3.bf16.msra.mxu0 %v1047_v14  ;;  %v1074_v30 = vpack.c.bf16 %v254_v28, %v253_v27  ;;  %v151_v34 = vld [vmem:[#allocation5 + $0x40] sm:$0xff]  ;;  %v152_v35 = vld [vmem:[#allocation5 + $0x48] sm:$0xff]  ;;  %v169_v36 = vld [vmem:[#allocation5 + $0xd0] sm:$0xff]  ;;  %v1077_v38 = vpack.c.bf16 %v256_v32, %v255_v31 }
  0x87   :  { %1050 = vmatprep.subr.bf16.mxu0 %v1049_v15  ;;  %v170_v37 = vld [vmem:[#allocation5 + $0xd8] sm:$0xff]  ;;  %v257_v39 = vld [vmem:[#allocation7 + $0x20] sm:$0xff]  ;;  %v258_v40 = vld [vmem:[#allocation7 + $0x28] sm:$0xff]  ;;  %v1059_v41 = vpack.c.bf16 %v152_v35, %v151_v34 }
  0x88   :  { %1075 = vmatpush3.bf16.msra.mxu1 %v1074_v30  ;;  %v1061_v42 = vpack.c.bf16 %v170_v37, %v169_v36  ;;  %v153_v43 = vld [vmem:[#allocation5 + $0x50] sm:$0xff]  ;;  %v154_v44 = vld [vmem:[#allocation5 + $0x58] sm:$0xff]  ;;  %v171_v45 = vld [vmem:[#allocation5 + $0xe0] sm:$0xff]  ;;  %v1080_v47 = vpack.c.bf16 %v258_v40, %v257_v39 }
  0x89   :  { %1076 = vmatprep.subr.bf16.mxu1 %v1446_v0  ;;  %v172_v46 = vld [vmem:[#allocation5 + $0xe8] sm:$0xff]  ;;  %v259_v48 = vld [vmem:[#allocation7 + $0x30] sm:$0xff]  ;;  %v260_v49 = vld [vmem:[#allocation7 + $0x38] sm:$0xff]  ;;  %v1063_v50 = vpack.c.bf16 %v154_v44, %v153_v43 }
  0x8a   :  { %1052 = vmatpush3.bf16.msra.mxu0 %v1051_v20  ;;  %v1065_v51 = vpack.c.bf16 %v172_v46, %v171_v45  ;;  %v155_v52 = vld [vmem:[#allocation5 + $0x60] sm:$0xff]  ;;  %v156_v53 = vld [vmem:[#allocation5 + $0x68] sm:$0xff]  ;;  %v173_v54 = vld [vmem:[#allocation5 + $0xf0] sm:$0xff]  ;;  %v1083_v56 = vpack.c.bf16 %v260_v49, %v259_v48 }
  0x8b   :  { %1054 = vmatprep.subr.bf16.mxu0 %v1053_v21  ;;  %v174_v55 = vld [vmem:[#allocation5 + $0xf8] sm:$0xff]  ;;  %v261_v57 = vld [vmem:[#allocation7 + $0x40] sm:$0xff]  ;;  %v262_v58 = vld [vmem:[#allocation7 + $0x48] sm:$0xff]  ;;  %v1067_v59 = vpack.c.bf16 %v156_v53, %v155_v52 }
  0x8c   :  { %1078 = vmatpush3.bf16.msra.mxu1 %v1077_v38  ;;  %v1069_v60 = vpack.c.bf16 %v174_v55, %v173_v54  ;;  %v157_v61 = vld [vmem:[#allocation5 + $0x70] sm:$0xff]  ;;  %v158_v62 = vld [vmem:[#allocation5 + $0x78] sm:$0xff]  ;;  %v1086_v63 = vpack.c.bf16 %v262_v58, %v261_v57  ;;  %v265_v6 = vld [vmem:[#allocation7 + $0x60] sm:$0xff] }
  0x8d   :  { %1079 = vmatprep.subr.bf16.mxu1 %v1446_v0  ;;  %v263_v1 = vld [vmem:[#allocation7 + $0x50] sm:$0xff]  ;;  %v264_v2 = vld [vmem:[#allocation7 + $0x58] sm:$0xff]  ;;  %v1071_v3 = vpack.c.bf16 %v158_v62, %v157_v61  ;;  %v266_v7 = vld [vmem:[#allocation7 + $0x68] sm:$0xff] }
  0x8e   :  { %1056 = vmatpush3.bf16.msra.mxu0 %v1055_v29  ;;  %v1089_v4 = vpack.c.bf16 %v264_v2, %v263_v1  ;;  %v141_v5 = vld [vmem:[#allocation2] sm:$0xff]  ;;  %v1092_v8 = vpack.c.bf16 %v266_v7, %v265_v6  ;;  %v268_v10 = vld [vmem:[#allocation7 + $0x78] sm:$0xff]  ;;  %v347_v13 = vld [vmem:[#allocation8] sm:$0xff] }
  0x8f   :  { %1058 = vmatprep.subr.bf16.mxu0 %v1057_v33  ;;  %v267_v9 = vld [vmem:[#allocation7 + $0x70] sm:$0xff]  ;;  %v348_v14 = vld [vmem:[#allocation8 + $0x8] sm:$0xff]  ;;  %v350_v17 = vld [vmem:[#allocation8 + $0x18] sm:$0xff] }
  0x90   :  { %1081 = vmatpush3.bf16.msra.mxu1 %v1080_v47  ;;  %v1095_v11 = vpack.c.bf16 %v268_v10, %v267_v9  ;;  %v349_v15 = vld [vmem:[#allocation8 + $0x10] sm:$0xff]  ;;  %v1098_v16 = vpack.c.bf16 %v348_v14, %v347_v13  ;;  %v351_v19 = vld [vmem:[#allocation8 + $0x20] sm:$0xff]  ;;  %v352_v20 = vld [vmem:[#allocation8 + $0x28] sm:$0xff] }
  0x91   :  { %1082 = vmatprep.subr.bf16.mxu1 %v1446_v0  ;;  %v1101_v18 = vpack.c.bf16 %v350_v17, %v349_v15  ;;  %v1104_v21 = vpack.c.bf16 %v352_v20, %v351_v19  ;;  %v353_v22 = vld [vmem:[#allocation8 + $0x30] sm:$0xff]  ;;  %v354_v23 = vld [vmem:[#allocation8 + $0x38] sm:$0xff]  ;;  %v355_v25 = vld [vmem:[#allocation8 + $0x40] sm:$0xff] }
  0x92   :  { %1060 = vmatpush3.bf16.msra.mxu0 %v1059_v41  ;;  %v1107_v24 = vpack.c.bf16 %v354_v23, %v353_v22  ;;  %v356_v26 = vld [vmem:[#allocation8 + $0x48] sm:$0xff]  ;;  %v357_v28 = vld [vmem:[#allocation8 + $0x50] sm:$0xff]  ;;  %v358_v29 = vld [vmem:[#allocation8 + $0x58] sm:$0xff] }
  0x93   :  { %1062 = vmatprep.subr.bf16.mxu0 %v1061_v42  ;;  %v1110_v27 = vpack.c.bf16 %v356_v26, %v355_v25  ;;  %v1113_v30 = vpack.c.bf16 %v358_v29, %v357_v28  ;;  %v359_v31 = vld [vmem:[#allocation8 + $0x60] sm:$0xff]  ;;  %v360_v32 = vld [vmem:[#allocation8 + $0x68] sm:$0xff]  ;;  %v791_v35 = vld [vmem:[%s1710_s2] ss:$0 sm:$0xff] }
  0x94   :  { %1084 = vmatpush3.bf16.msra.mxu1 %v1083_v56  ;;  %v1116_v33 = vpack.c.bf16 %v360_v32, %v359_v31  ;;  %v361_v40 = vld [vmem:[#allocation8 + $0x70] sm:$0xff]  ;;  %v362_v41 = vld [vmem:[#allocation8 + $0x78] sm:$0xff]  ;;  %v442_v43 = vld [vmem:[#allocation10] sm:$0xff] }
  0x95   :  { %1085 = vmatprep.subr.bf16.mxu1 %v1446_v0  ;;  %v1119_v42 = vpack.c.bf16 %v362_v41, %v361_v40  ;;  %v443_v44 = vld [vmem:[#allocation10 + $0x8] sm:$0xff]  ;;  %v444_v45 = vld [vmem:[#allocation10 + $0x10] sm:$0xff]  ;;  %v445_v47 = vld [vmem:[#allocation10 + $0x18] sm:$0xff] }
  0x96   :  { %1064 = vmatpush3.bf16.msra.mxu0 %v1063_v50  ;;  %v1122_v46 = vpack.c.bf16 %v443_v44, %v442_v43  ;;  %v1125_v48 = vpack.c.bf16 %v445_v47, %v444_v45  ;;  %v446_v49 = vld [vmem:[#allocation10 + $0x20] sm:$0xff]  ;;  %v447_v50 = vld [vmem:[#allocation10 + $0x28] sm:$0xff]  ;;  %v448_v52 = vld [vmem:[#allocation10 + $0x30] sm:$0xff] }
  0x97   :  { %1066 = vmatprep.subr.bf16.mxu0 %v1065_v51  ;;  %v1128_v51 = vpack.c.bf16 %v447_v50, %v446_v49  ;;  %v449_v53 = vld [vmem:[#allocation10 + $0x38] sm:$0xff]  ;;  %v450_v55 = vld [vmem:[#allocation10 + $0x40] sm:$0xff]  ;;  %v451_v56 = vld [vmem:[#allocation10 + $0x48] sm:$0xff] }
  0x98   :  { %1087 = vmatpush3.bf16.msra.mxu1 %v1086_v63  ;;  %v1131_v54 = vpack.c.bf16 %v449_v53, %v448_v52  ;;  %v1134_v57 = vpack.c.bf16 %v451_v56, %v450_v55  ;;  %v452_v58 = vld [vmem:[#allocation10 + $0x50] sm:$0xff]  ;;  %v454_v61 = vld [vmem:[#allocation10 + $0x60] sm:$0xff]  ;;  %v455_v62 = vld [vmem:[#allocation10 + $0x68] sm:$0xff] }
  0x99   :  { %1088 = vmatprep.subr.bf16.mxu1 %v1446_v0  ;;  %v1140_v63 = vpack.c.bf16 %v455_v62, %v454_v61  ;;  %v792_v1 = vld [vmem:[%s1712_s4] ss:$0 sm:$0xff]  ;;  %v457_v7 = vld [vmem:[#allocation10 + $0x78] sm:$0xff]  ;;  %v536_v9 = vld [vmem:[#allocation11] sm:$0xff] }
  0x9a   :  { %1068 = vmatpush3.bf16.msra.mxu0 %v1067_v59  ;;  %v453_v59 = vld [vmem:[#allocation10 + $0x58] sm:$0xff]  ;;  %v456_v6 = vld [vmem:[#allocation10 + $0x70] sm:$0xff]  ;;  %v537_v10 = vld [vmem:[#allocation11 + $0x8] sm:$0xff] }
  0x9b   :  { %1070 = vmatprep.subr.bf16.mxu0 %v1069_v60  ;;  %v1137_v60 = vpack.c.bf16 %v453_v59, %v452_v58  ;;  %v1146_v13 = vpack.c.bf16 %v537_v10, %v536_v9  ;;  %v539_v14 = vld [vmem:[#allocation11 + $0x18] sm:$0xff]  ;;  %v541_v17 = vld [vmem:[#allocation11 + $0x28] sm:$0xff]  ;;  %v542_v19 = vld [vmem:[#allocation11 + $0x30] sm:$0xff] }
  0x9c   :  { %1090 = vmatpush3.bf16.msra.mxu1 %v1089_v4  ;;  %v543_v20 = vld [vmem:[#allocation11 + $0x38] sm:$0xff]  ;;  %v544_v22 = vld [vmem:[#allocation11 + $0x40] sm:$0xff]  ;;  %v545_v23 = vld [vmem:[#allocation11 + $0x48] sm:$0xff] }
  0x9d   :  { %1091 = vmatprep.subr.bf16.mxu1 %v1446_v0  ;;  %v546_v25 = vld [vmem:[#allocation11 + $0x50] sm:$0xff]  ;;  %v547_v26 = vld [vmem:[#allocation11 + $0x58] sm:$0xff]  ;;  %v548_v28 = vld [vmem:[#allocation11 + $0x60] sm:$0xff] }
  0x9e   :  { %1072 = vmatpush3.bf16.msra.mxu0 %v1071_v3  ;;  %v549_v29 = vld [vmem:[#allocation11 + $0x68] sm:$0xff]  ;;  %v793_v31 = vld [vmem:[%s1714_s6] ss:$0 sm:$0xff]  ;;  %v630_v40 = vld [vmem:[#allocation13] sm:$0xff] }
  0x9f   :  { %1097 = vmatprep.subr.bf16.mxu0 %v1446_v0  ;;  %v632_v41 = vld [vmem:[#allocation13 + $0x10] sm:$0xff]  ;;  %v637_v43 = vld [vmem:[#allocation13 + $0x38] sm:$0xff]  ;;  %v643_v53 = vld [vmem:[#allocation13 + $0x68] sm:$0xff] }
  0xa0   :  { %1093 = vmatpush3.bf16.msra.mxu1 %v1092_v8  ;;  %v1143_v8 = vpack.c.bf16 %v457_v7, %v456_v6  ;;  %v1171_v44 = vpack.c.bf16 %v632_v41, %v630_v40  ;;  %v636_v47 = vld [vmem:[#allocation13 + $0x30] sm:$0xff]  ;;  %v641_v49 = vld [vmem:[#allocation13 + $0x58] sm:$0xff]  ;;  %v647_v59 = vld [vmem:[#allocation13 + $0x88] sm:$0xff] }
  0xa1   :  { %247 = vmatmul.mubr.f32.vlgmr.msra.gmra.mrb[0].mxu0 %v141_v5  ;;  %1094 = vmatprep.subr.bf16.mxu1 %v1446_v0  ;;  %v640_v52 = vld [vmem:[#allocation13 + $0x50] sm:$0xff]  ;;  %v650_v6 = vld [vmem:[#allocation13 + $0xa0] sm:$0xff]  ;;  %v657_v9 = vld [vmem:[#allocation13 + $0xd8] sm:$0xff] }
  0xa2   :  { %968 = vmatprep.mubr.msk.f32.mxu0 %vm1447_vm0, %v1448_v12  ;;  %1099 = vmatpush3.bf16.msra.mxu0 %v1098_v16  ;;  %v540_v16 = vld [vmem:[#allocation11 + $0x20] sm:$0xff]  ;;  %v644_v58 = vld [vmem:[#allocation13 + $0x70] sm:$0xff] }
  0xa3   :  { %1100 = vmatprep.subr.bf16.mxu0 %v1446_v0  ;;  %v652_v7 = vld [vmem:[#allocation13 + $0xb0] sm:$0xff] }
  0xa4   :  { %1096 = vmatpush3.bf16.msra.mxu1 %v1095_v11  ;;  %v538_v11 = vld [vmem:[#allocation11 + $0x10] sm:$0xff]  ;;  %v1191_v10 = vpack.c.bf16 %v652_v7, %v650_v6 }
  0xa5   :  { %1121 = vmatprep.subr.bf16.mxu1 %v1446_v0  ;;  %v1149_v15 = vpack.c.bf16 %v539_v14, %v538_v11  ;;  %v656_v14 = vld [vmem:[#allocation13 + $0xd0] sm:$0xff] }
  0xa6   :  { %1102 = vmatpush3.bf16.msra.mxu0 %v1101_v18  ;;  %v1152_v18 = vpack.c.bf16 %v541_v17, %v540_v16  ;;  %v794_v16 = vld [vmem:[%s1716_s8] ss:$0 sm:$0xff]  ;;  %s1449_s8 = smov [#allocation15]  }
  0xa7   :  { %1103 = vmatprep.subr.bf16.mxu0 %v1446_v0  ;;  %s775_s21 = sshll.u32 %s1449_s8, 4  ;;  %s776_s21 = int_to_ptr.vmem [resolvable:$true] %s775_s21 }
  0xa8   :  { %s1379_s3 = scalar_lea.vmem %s776_s21, 128  ;;  %p1384_p1 = scmp.lt.s32.totalorder %s776_s21, %s776_s21 }
  0xa9   :  { %p1380_p0 = scmp.ne.s32.totalorder %s776_s21, %s1379_s3  ;;  %p1385_p2 = scmp.lt.s32.totalorder %s1379_s3, %s1379_s3 }
  0xaa   :  { %1105 = vmatpush3.bf16.msra.mxu0 %v1104_v21  ;;  %v1155_v21 = vpack.c.bf16 %v543_v20, %v542_v19 }
  0xab   :  { %1106 = vmatprep.subr.bf16.mxu0 %v1446_v0  ;;  %p1386_p3 = por %p1385_p2, %p1384_p1 }
  0xad   :  { %p1387_p4 = pnand %p1386_p3, %p1380_p0 }
  0xae   :  { %1108 = vmatpush3.bf16.msra.mxu0 %v1107_v24  ;;  %v1158_v24 = vpack.c.bf16 %v545_v23, %v544_v22  ;;  %v661_v22 = vld [vmem:[#allocation13 + $0xf8] sm:$0xff] }
  0xaf   :  { %1109 = vmatprep.subr.bf16.mxu0 %v1446_v0 }
  0xb2   :  { %1111 = vmatpush3.bf16.msra.mxu0 %v1110_v27  ;;  %v1161_v27 = vpack.c.bf16 %v547_v26, %v546_v25  ;;  %v660_v25 = vld [vmem:[#allocation13 + $0xf0] sm:$0xff] }
  0xb3   :  { %1112 = vmatprep.subr.bf16.mxu0 %v1446_v0 }
  0xb6   :  { %1114 = vmatpush3.bf16.msra.mxu0 %v1113_v30  ;;  %v1164_v30 = vpack.c.bf16 %v549_v29, %v548_v28 }
  0xb7   :  { %1115 = vmatprep.subr.bf16.mxu0 %v1446_v0 }
  0xba   :  { %1117 = vmatpush3.bf16.msra.mxu0 %v1116_v33 }
  0xbb   :  { %1118 = vmatprep.subr.bf16.mxu0 %v1446_v0 }
  0xbe   :  { %1120 = vmatpush3.bf16.msra.mxu0 %v1119_v42  ;;  %v635_v42 = vld [vmem:[#allocation13 + $0x28] sm:$0xff] }
  0xbf   :  { %1145 = vmatprep.subr.bf16.mxu0 %v1446_v0  ;;  %v1173_v45 = vpack.c.bf16 %v637_v43, %v635_v42 }
 0x174   :  { %v830_v34 = vpop.f32.mrb[0].mxu0 }
 0x175   :  { %v831_v36 = vpop.f32.mrb[1].mxu0 }
 0x176   :  { %v832_v37 = vadd.f32 %v831_v36, %v830_v34  ;;  %v551_v36 = vld [vmem:[#allocation11 + $0x78] sm:$0xff] }
 0x178   :  { %v249_v38 = vadd.f32 %v832_v37, %v791_v35  ;;  %v550_v35 = vld [vmem:[#allocation11 + $0x70] sm:$0xff] }
 0x179   :  { %v1167_v37 = vpack.c.bf16 %v551_v36, %v550_v35 }
 0x17a   :  { %v252_v39 = vmax.f32 %v249_v38, 0.0  ;;  %v631_v38 = vld [vmem:[#allocation13 + $0x8] sm:$0xff] }
 0x17c   :  { %934 = vmatmul.mubr.f32.vlgmr.msra.gmra.mrb[0].mxu1 %v252_v39  ;;  %v633_v39 = vld [vmem:[#allocation13 + $0x18] sm:$0xff] }
 0x17d   :  { %1003 = vmatprep.mubr.msk.f32.mxu1 %vm1447_vm0, %v1448_v12  ;;  %1123 = vmatpush3.bf16.msra.mxu1 %v1122_v46  ;;  %v634_v46 = vld [vmem:[#allocation13 + $0x20] sm:$0xff] }
 0x17e   :  { %1124 = vmatprep.subr.bf16.mxu1 %v1446_v0 }
 0x181   :  { %1126 = vmatpush3.bf16.msra.mxu1 %v1125_v48  ;;  %v639_v48 = vld [vmem:[#allocation13 + $0x48] sm:$0xff] }
 0x182   :  { %1127 = vmatprep.subr.bf16.mxu1 %v1446_v0  ;;  %v1177_v50 = vpack.c.bf16 %v641_v49, %v639_v48 }
 0x185   :  { %1129 = vmatpush3.bf16.msra.mxu1 %v1128_v51  ;;  %v638_v51 = vld [vmem:[#allocation13 + $0x40] sm:$0xff] }
 0x186   :  { %1130 = vmatprep.subr.bf16.mxu1 %v1446_v0  ;;  %v1179_v55 = vpack.c.bf16 %v640_v52, %v638_v51 }
 0x189   :  { %1132 = vmatpush3.bf16.msra.mxu1 %v1131_v54  ;;  %v645_v54 = vld [vmem:[#allocation13 + $0x78] sm:$0xff] }
 0x18a   :  { %1133 = vmatprep.subr.bf16.mxu1 %v1446_v0  ;;  %v1181_v56 = vpack.c.bf16 %v645_v54, %v643_v53 }
 0x18d   :  { %1135 = vmatpush3.bf16.msra.mxu1 %v1134_v57  ;;  %v642_v57 = vld [vmem:[#allocation13 + $0x60] sm:$0xff] }
 0x18e   :  { %1136 = vmatprep.subr.bf16.mxu1 %v1446_v0  ;;  %v1183_v61 = vpack.c.bf16 %v644_v58, %v642_v57 }
 0x191   :  { %1138 = vmatpush3.bf16.msra.mxu1 %v1137_v60  ;;  %v649_v60 = vld [vmem:[#allocation13 + $0x98] sm:$0xff] }
 0x192   :  { %1139 = vmatprep.subr.bf16.mxu1 %v1446_v0  ;;  %v1185_v62 = vpack.c.bf16 %v649_v60, %v647_v59 }
 0x195   :  { %1141 = vmatpush3.bf16.msra.mxu1 %v1140_v63  ;;  %v646_v63 = vld [vmem:[#allocation13 + $0x80] sm:$0xff] }
 0x196   :  { %1142 = vmatprep.subr.bf16.mxu1 %v1446_v0 }
 0x199   :  { %1144 = vmatpush3.bf16.msra.mxu1 %v1143_v8  ;;  %v655_v8 = vld [vmem:[#allocation13 + $0xc8] sm:$0xff] }
 0x19a   :  { %v1193_v11 = vpack.c.bf16 %v657_v9, %v655_v8 }
 0x24f   :  { %v342_v2 = vpop.f32.mrb[0].mxu1 }
 0x250   :  { %v343_v3 = vadd.f32 %v792_v1, %v342_v2  ;;  %v935_v4 = vpop.f32.mrb[1].mxu1  ;;  %v648_v1 = vld [vmem:[#allocation13 + $0x90] sm:$0xff]  ;;  %v651_v2 = vld [vmem:[#allocation13 + $0xa8] sm:$0xff] }
 0x251   :  { %v1187_v4 = vpack.c.bf16 %v648_v1, %v646_v63 }
 0x252   :  { %v346_v5 = vmax.f32 %v343_v3, 0.0  ;;  %v653_v3 = vld [vmem:[#allocation13 + $0xb8] sm:$0xff] }
 0x254   :  { %969 = vmatmul.mubr.f32.vlgmr.msra.gmra.mrb[2].mxu0 %v346_v5  ;;  %v1189_v5 = vpack.c.bf16 %v653_v3, %v651_v2 }
 0x255   :  { %1038 = vmatprep.mubr.msk.f32.mxu0 %vm1447_vm0, %v1448_v12  ;;  %1147 = vmatpush3.bf16.msra.mxu0 %v1146_v13  ;;  %v654_v13 = vld [vmem:[#allocation13 + $0xc0] sm:$0xff] }
 0x256   :  { %1148 = vmatprep.subr.bf16.mxu0 %v1446_v0 }
 0x259   :  { %1150 = vmatpush3.bf16.msra.mxu0 %v1149_v15  ;;  %v1195_v15 = vpack.c.bf16 %v656_v14, %v654_v13 }
 0x25a   :  { %1151 = vmatprep.subr.bf16.mxu0 %v1446_v0 }
 0x25d   :  { %1153 = vmatpush3.bf16.msra.mxu0 %v1152_v18 }
 0x25e   :  { %1154 = vmatprep.subr.bf16.mxu0 %v1446_v0 }
 0x261   :  { %1156 = vmatpush3.bf16.msra.mxu0 %v1155_v21  ;;  %v659_v21 = vld [vmem:[#allocation13 + $0xe8] sm:$0xff] }
 0x262   :  { %1157 = vmatprep.subr.bf16.mxu0 %v1446_v0  ;;  %v1197_v23 = vpack.c.bf16 %v661_v22, %v659_v21 }
 0x265   :  { %1159 = vmatpush3.bf16.msra.mxu0 %v1158_v24  ;;  %v658_v24 = vld [vmem:[#allocation13 + $0xe0] sm:$0xff] }
 0x266   :  { %1160 = vmatprep.subr.bf16.mxu0 %v1446_v0  ;;  %v1199_v26 = vpack.c.bf16 %v660_v25, %v658_v24 }
 0x269   :  { %1162 = vmatpush3.bf16.msra.mxu0 %v1161_v27  ;;  %v795_v27 = vld [vmem:[%s1718_s10] ss:$0 sm:$0xff] }
 0x26a   :  { %1163 = vmatprep.subr.bf16.mxu0 %v1446_v0 }
 0x26d   :  { %1165 = vmatpush3.bf16.msra.mxu0 %v1164_v30 }
 0x26e   :  { %1166 = vmatprep.subr.bf16.mxu0 %v1446_v0  ;;  %v1169_v0 = vpack.c.bf16 %v633_v39, %v631_v38 }
 0x270   :  { %1170 = vmatprep.subr.bf16.mxu1 %v1169_v0 }
 0x271   :  { %1168 = vmatpush3.bf16.msra.mxu0 %v1167_v37 }
 0x327   :  { %v436_v32 = vpop.f32.mrb[2].mxu0 }
 0x328   :  { %v437_v33 = vadd.f32 %v793_v31, %v436_v32  ;;  %v970_v34 = vpop.f32.mrb[3].mxu0 }
 0x32a   :  { %1004 = vmatmul.mubr.f32.vlgmr.msra.gmra.mrb[2].mxu1 %v437_v33  ;;  %441 = vst.msk [vmem:[#allocation15] sm:$0xff] %vm440_vm1, %v437_v33 }
 0x32b   :  { %738 = vmatprep.mubr.f32.mxu1 %v1448_v12  ;;  %1172 = vmatpush1.bf16.msra.mxu1 %v1171_v44  ;;  %v1175_v12 = vpack.c.bf16 %v636_v47, %v634_v46 }
 0x32c   :  { %1174 = vmatprep.subr.bf16.mxu1 %v1173_v45 }
 0x32f   :  { %1176 = vmatpush1.bf16.msra.mxu1 %v1175_v12 }
 0x330   :  { %1178 = vmatprep.subr.bf16.mxu1 %v1177_v50 }
 0x333   :  { %1180 = vmatpush1.bf16.msra.mxu1 %v1179_v55 }
 0x334   :  { %1182 = vmatprep.subr.bf16.mxu1 %v1181_v56 }
 0x337   :  { %1184 = vmatpush1.bf16.msra.mxu1 %v1183_v61 }
 0x338   :  { %1186 = vmatprep.subr.bf16.mxu1 %v1185_v62 }
 0x33b   :  { %1188 = vmatpush1.bf16.msra.mxu1 %v1187_v4 }
 0x33c   :  { %1190 = vmatprep.subr.bf16.mxu1 %v1189_v5 }
 0x33f   :  { %1192 = vmatpush1.bf16.msra.mxu1 %v1191_v10 }
 0x340   :  { %1194 = vmatprep.subr.bf16.mxu1 %v1193_v11 }
 0x343   :  { %1196 = vmatpush1.bf16.msra.mxu1 %v1195_v15 }
 0x344   :  { %1198 = vmatprep.subr.bf16.mxu1 %v1197_v23 }
 0x347   :  { %1200 = vmatpush1.bf16.msra.mxu1 %v1199_v26 }
 0x3fd   :  { %v531_v17 = vpop.f32.mrb[2].mxu1 }
 0x3fe   :  { %v532_v18 = vadd.f32 %v794_v16, %v531_v17  ;;  %v1005_v19 = vpop.f32.mrb[3].mxu1 }
 0x400   :  { %v535_v20 = vmax.f32 %v532_v18, 0.0 }
 0x402   :  { %1039 = vmatmul.mubr.f32.vlgmr.msra.gmra.mrb[4].mxu0 %v535_v20 }
 0x4d5   :  { %v625_v28 = vpop.f32.mrb[4].mxu0 }
 0x4d6   :  { %v626_v29 = vadd.f32 %v795_v27, %v625_v28  ;;  %v1040_v30 = vpop.f32.mrb[5].mxu0 }
 0x4d8   :  { %v629_v31 = vmax.f32 %v626_v29, 0.0 }
 0x4da   :  { %739 = vmatmul.mubr.f32.vlgmr.msra.gmra.mrb[4].mxu1 %v629_v31 }
 0x4db   :  { %1390 = shalt.err (!%p1387_p4)
}
 0x4dc   :  { %s1391_s25 = scalar_lea.hbm %s1722_s14, 128 }
 0x4dd   :  { %p1392_p5 = scmp.ne.s32.totalorder %s1722_s14, %s1391_s25  ;;  %p1395_p6 = scmp.lt.u32.totalorder %s1391_s25, %s1722_s14 }
 0x4df   :  { %p1397_p7 = pnand %p1395_p6, %p1392_p5 }
 0x4e1   :  { %1400 = shalt.err (!%p1397_p7)
}
 0x4e2   :  { %778 = dma.vmem_to_hbm [thread:$0]  %s776_s21, 128, %s1722_s14, [#allocation16]   ;;  %v664_v32 = vlaneseq  ;;  %v662_v35 = vld [vmem:[%s1720_s12] sm:$0x3] }
 0x4e3   :  { %s1450_s14 = smov [#allocation14]  }
 0x4e4   :  { %v665_v33 = vshrl.u32 %v664_v32, 7  ;;  %s765_s7 = sshll.u32 %s1450_s14, 4  ;;  %s766_s7 = int_to_ptr.vmem [resolvable:$true] %s765_s7 }
 0x4e5   :  { %s1401_s12 = scalar_lea.vmem %s766_s7, 256  ;;  %p1406_p9 = scmp.lt.s32.totalorder %s766_s7, %s766_s7 }
 0x4e6   :  { %v666_v34 = vsub.s32 0, %v665_v33  ;;  %v670_v36 = vsub.s32 1, %v665_v33  ;;  %p1402_p8 = scmp.ne.s32.totalorder %s766_s7, %s1401_s12  ;;  %p1407_p10 = scmp.lt.s32.totalorder %s1401_s12, %s1401_s12 }
 0x4e8   :  { %v667_v37 = vrot.slane %v662_v35, %v666_v34  ;;  %v671_v38 = vrot.slane %v662_v35, %v670_v36  ;;  %p1408_p11 = por %p1407_p10, %p1406_p9 }
 0x4ea   :  { %p1409_p12 = pnand %p1408_p11, %p1402_p8 }
 0x5ad   :  { %v740_v39 = vpop.f32.mrb[4].mxu1 }
 0x5ae   :  { %v741_v40 = vadd.f32 %v740_v39, %v667_v37  ;;  %v742_v0 = vpop.f32.mrb[5].mxu1 }
 0x5af   :  { %v743_v41 = vadd.f32 %v742_v0, %v671_v38 }
 0x5b0   :  { %v796_v42 = vmul.f32 -1.442695, %v741_v40 }
 0x5b1   :  { %v797_v43 = vmul.f32 -1.442695, %v743_v41 }
 0x5b2   :  { %1217 = vpow2.f32 %v796_v42 }
 0x5b3   :  { %1219 = vpow2.f32 %v797_v43 }
 0x5bc   :  { %v1218_v44 = vpop.eup %1217 }
 0x5bd   :  { %v1220_v45 = vpop.eup %1219  ;;  %v751_v46 = vadd.f32 1.0, %v1218_v44 }
 0x5be   :  { %v752_v47 = vadd.f32 1.0, %v1220_v45 }
 0x5bf   :  { %1221 = vrcp.f32 %v751_v46 }
 0x5c0   :  { %1223 = vrcp.f32 %v752_v47 }
 0x5c9   :  { %v1222_v48 = vpop.eup %1221 }
 0x5ca   :  { %v1224_v49 = vpop.eup %1223  ;;  %757 = vst [vmem:[#allocation14] sm:$0xff] %v1222_v48 }
 0x5cb   :  { %758 = vst [vmem:[#allocation14 + $0x8] sm:$0xff] %v1224_v49 }
 0x5cc   :  { %1412 = shalt.err (!%p1409_p12)
}
 0x5cd   :  { %s1413_s16 = scalar_lea.hbm %s1721_s13, 256 }
 0x5ce   :  { %p1414_p13 = scmp.ne.s32.totalorder %s1721_s13, %s1413_s16  ;;  %p1417_p0 = scmp.lt.u32.totalorder %s1413_s16, %s1721_s13 }
 0x5d0   :  { %p1419_p1 = pnand %p1417_p0, %p1414_p13 }
 0x5d2   :  { %1422 = shalt.err (!%p1419_p1)
}
 0x5d3   :  { %768 = dma.vmem_to_hbm [thread:$0]  %s766_s7, 256, %s1721_s13, [#allocation4]  }
 0x5d4   :  { %1431 = dma.done.wait [#allocation4], 256  }
 0x5d5   :  { %1432 = vsyncadd [#allocation4], 4294967040 }
 0x5d6   :  { %1433 = dma.done.wait [#allocation16], 128  }
 0x5d7   :  { %1434 = vsyncadd [#allocation16], 4294967168 }
 0x5d8   :  { %785 = vsyncpa [#allocation3], 1 }
 0x5d9   :  { %786 = vsyncpa [#allocation6], 1 }
 0x5da   :  { %787 = vsyncpa [#allocation9], 1 }
 0x5db   :  { %788 = vsyncpa [#allocation12], 1 }
 0x5dc   :  { %789 = vsyncpa [#allocation4], 1 }
 0x5dd   :  { %790 = vsyncpa [#allocation16], 1 }

</bundles_post_ra>
